<compile_context>
chip_gen: v7x
topology: tpu7x:2x2x1
jax: 0.10.0
libtpu: 0.0.40
codegen_flags: <defaults>
</compile_context>

<pallas_src>
import math
from functools import partial

import numpy as np
import jax
import jax.numpy as jnp
from jax import lax
from jax.experimental import pallas as pl
from jax.experimental.pallas import tpu as pltpu


def _round_up(x, m):
    return ((x + m - 1) // m) * m


def _conv_out(n, k, s, p):
    return (n + 2 * p - k) // s + 1


def _vmem_limit_bytes():
    # v7x has 64 MiB of VMEM per TensorCore; v5e/v6e have 128 MiB.
    try:
        kind = jax.devices()[0].device_kind.lower()
    except Exception:  # pragma: no cover
        kind = ""
    is_v7 = ("v7" in kind) or ("7x" in kind)
    return (48 if is_v7 else 100) * 1024 * 1024


# ----------------------------- fused Pallas kernel ---------------------------------------

def _fused_block_kernel(xs_ref, w_ref, p_ref, rb_ref, o_ref, *,
                        s, k, Hc, Ho, Wo, Do, cout, alpha, eps):
    """One batch item per grid step.  D and channels are merged in the lane axis.

    xs_ref : (s^2*Hc, Wc, Dp*Cin)       bf16  H/W phase-split, zero-padded input block
    w_ref  : (k^2, Dp*Cin, 2*Do*Cout)   bf16  D-banded [main | residual] conv weights
    p_ref  : (Do*Cout, Do*Cout)         f32   channel projection  P[d*C+o, d'*C+o'] = (o==o')
    rb_ref : (1, Do*Cout)               f32   residual-conv bias tiled over d
    o_ref  : (1, Ho*Wo, Do*Cout)        bf16  fused block output, lane order (d, c)
    """
    L = xs_ref.shape[-1]          # Dp * Cin
    M = Ho * Wo
    Nm = Do * cout

    # 9 MXU GEMMs, f32 accumulation.  Each (kh,kw) tap reads one unstrided window of the
    # phase-split input; the kd taps + D stride live in the banded weight matrix.
    acc = jnp.zeros((M, 2 * Nm), jnp.float32)
    t = 0
    for kh in range(k):
        ph, oh = kh % s, kh // s
        for kw in range(k):
            pw, ow = kw % s, kw // s
            r0 = (ph * s + pw) * Hc + oh
            win = xs_ref[r0:r0 + Ho, ow:ow + Wo, :]            # (Ho, Wo, L) bf16
            acc = acc + jnp.dot(win.reshape(M, L), w_ref[t],
                                preferred_element_type=jnp.float32)
            t += 1

    cx = acc[:, :Nm]                      # main conv (bias omitted: cancels under InstanceNorm)
    res = acc[:, Nm:] + rb_ref[...]       # residual conv + bias

    # InstanceNorm3d statistics per channel: reduce over the (h,w) rows, then over the d
    # lanes via the 0/1 projection matmul (keeps everything in the merged-lane layout).
    inv_n = 1.0 / float(Ho * Wo * Do)
    srow = jnp.sum(cx, axis=0, keepdims=True)                  # (1, Nm)
    qrow = jnp.sum(cx * cx, axis=0, keepdims=True)             # (1, Nm)
    mean = jnp.dot(srow, p_ref[...], preferred_element_type=jnp.float32) * inv_n
    ex2 = jnp.dot(qrow, p_ref[...], preferred_element_type=jnp.float32) * inv_n
    var = jnp.maximum(ex2 - mean * mean, 0.0)                  # biased variance, clamped
    xn = (cx - mean) * lax.rsqrt(var + eps)

    act = jnp.where(xn >= 0.0, xn, alpha * xn)                 # PReLU, single shared alpha
    o_ref[0] = (act + res).astype(o_ref.dtype)                 # residual add, bf16 store


def fused_block(x, hwd, cin, w, rw, rb, stride, alpha, *, k=3, eps=1e-5):
    """x: (B, H, W, D*Cin) bf16 (D and channels merged in the lane dim).

    Computes  PReLU(InstanceNorm3d(conv3d(x, w, stride, pad=1))) + conv3d(x, rw, rb, ...)
    with one fused Pallas kernel per batch item.  Returns ((B, Ho, Wo, Do*Cout) bf16, dims)."""
    B = x.shape[0]
    H, W, D = hwd
    Cout = w.shape[0]
    s = stride
    p = (k - 1) // 2
    Ho, Wo, Do = (_conv_out(n, k, s, p) for n in (H, W, D))
    Hp, Wp = _round_up(H + 2 * p, s), _round_up(W + 2 * p, s)
    Dp = D + 2 * p
    Hc, Wc = Hp // s, Wp // s
    L = Dp * cin
    Nm = Do * Cout
    M = Ho * Wo

    # ---- zero-pad + H/W phase split (single bf16 XLA copy).  D padding is a lane-dim pad
    #      because D and C are merged; no D phase split is needed (it is handled by the
    #      banded weights). ----
    xp = jnp.pad(x, ((0, 0), (p, Hp - H - p), (p, Wp - W - p),
                     (p * cin, (Dp - D - p) * cin)))
    xs = xp.reshape(B, Hc, s, Wc, s, L)
    xs = jnp.transpose(xs, (0, 2, 4, 1, 3, 5)).reshape(B * s * s * Hc, Wc, L)

    # ---- D-banded weights: W[kh*k+kw, di*Cin+c, d*Cout+o] = w[o,c,kh,kw,di-d*s] (else 0),
    #      main and residual convs concatenated along the output columns. ----
    sel = np.zeros((Dp, k, Do), np.float32)
    for d in range(Do):
        for kd in range(k):
            sel[d * s + kd, kd, d] = 1.0
    sel = jnp.asarray(sel)

    def band(wgt):
        t = jnp.einsum('ekd,ocxyk->xyecdo', sel, wgt)          # (k,k,Dp,Cin,Do,Cout)
        return t.reshape(k * k, L, Nm)

    w_big = jnp.concatenate([band(w), band(rw)], axis=-1).astype(jnp.bfloat16)

    # 0/1 projection (sums the d copies of each channel) and tiled residual bias.
    proj = jnp.asarray(np.tile(np.eye(Cout, dtype=np.float32), (Do, Do)))   # (Nm, Nm)
    rb_t = jnp.tile(rb.reshape(1, Cout).astype(jnp.float32), (1, Do))       # (1, Nm)

    kernel = partial(_fused_block_kernel, s=s, k=k, Hc=Hc, Ho=Ho, Wo=Wo, Do=Do,
                     cout=Cout, alpha=float(alpha), eps=eps)

    out = pl.pallas_call(
        kernel,
        out_shape=jax.ShapeDtypeStruct((B, M, Nm), jnp.bfloat16),
        grid=(B,),
        in_specs=[
            pl.BlockSpec((s * s * Hc, Wc, L), lambda bb: (bb, 0, 0)),
            pl.BlockSpec((k * k, L, 2 * Nm), lambda bb: (0, 0, 0)),
            pl.BlockSpec((Nm, Nm), lambda bb: (0, 0)),
            pl.BlockSpec((1, Nm), lambda bb: (0, 0)),
        ],
        out_specs=pl.BlockSpec((1, M, Nm), lambda bb: (bb, 0, 0)),
        compiler_params=pltpu.CompilerParams(
            dimension_semantics=("parallel",),
            vmem_limit_bytes=_vmem_limit_bytes()),
    )(xs, w_big, proj, rb_t)

    # Lane order is (d, c) so this is a contiguous (copy-free) reshape.
    return out.reshape(B, Ho, Wo, Nm), (Ho, Wo, Do)


# ----------------------------- parameters & forward --------------------------------------

def kaiming_normal(key, shape):
    # torch.nn.init.kaiming_normal_: gain=sqrt(2), fan_in = Cin * prod(kernel)
    fan_in = int(np.prod(shape[1:]))
    std = math.sqrt(2.0 / fan_in)
    return jax.random.normal(key, shape, jnp.float32) * std


def init_encoder_params(key, in_channels, channels, strides, k=3):
    params = []
    cin = in_channels
    for cout, s in zip(channels, strides):
        key, k1, k2 = jax.random.split(key, 3)
        p = {"w": kaiming_normal(k1, (cout, cin, k, k, k)),
             "b": jnp.zeros((cout,), jnp.float32),
             "alpha": jnp.float32(0.25)}          # PReLU default init (not touched by init_weights)
        if s != 1 or cin != cout:
            if s == 1:
                p["rw"] = kaiming_normal(k2, (cout, cin, 1, 1, 1))
            else:
                p["rw"] = kaiming_normal(k2, (cout, cin, k, k, k))
            p["rb"] = jnp.zeros((cout,), jnp.float32)
        params.append(p)
        cin = cout
    return params


def _residual_weights(p, cin, cout, s, k):
    """3x3x3 residual-conv weights/bias covering all MONAI ResidualUnit cases."""
    c = k // 2
    if s != 1 or cin != cout:
        if s == 1:
            # 1x1x1 residual conv (pad 0) == 3x3x3 conv (pad 1) with the weight at the
            # centre tap and zeros elsewhere.
            rw = jnp.zeros((cout, cin, k, k, k), jnp.float32)
            rw = rw.at[:, :, c, c, c].set(p["rw"][:, :, 0, 0, 0])
            return rw, p["rb"]
        return p["rw"], p["rb"]
    # identity skip == 3x3x3 conv with an identity kernel at the centre tap.
    # TODO(synk): identity skip goes through the bf16 GEMM (tiny extra rounding vs f32 add).
    rw = jnp.zeros((cout, cin, k, k, k), jnp.float32)
    rw = rw.at[:, :, c, c, c].set(jnp.eye(cout, dtype=jnp.float32))
    return rw, jnp.zeros((cout,), jnp.float32)


def unet3d_encoder_forward(x_ncdhw, params, channels, strides, in_channels, k=3):
    B, C, H, W, D = x_ncdhw.shape
    # NCDHW -> channels-last with D and C merged in the lane dim, bf16.
    x = jnp.transpose(x_ncdhw, (0, 2, 3, 4, 1)).reshape(B, H, W, D * C).astype(jnp.bfloat16)
    dims = (H, W, D)
    cin = in_channels
    for p_, cout, s in zip(params, channels, strides):
        rw, rb = _residual_weights(p_, cin, cout, s, k)
        x, dims = fused_block(x, dims, cin, p_["w"], rw, rb, s, p_["alpha"], k=k)
        cin = cout
    Ho, Wo, Do = dims
    # lane order is already (d, c): 'b c h w d -> b (h w d) c' is a contiguous reshape.
    return x.reshape(B, Ho * Wo * Do, cin).astype(jnp.float32)


# ----------------------------- pure-JAX reference ----------------------------------------

def _conv3d_ref(x_cl, w, b, stride, pad):
    x_nc = jnp.transpose(x_cl, (0, 4, 1, 2, 3))
    out = jax.lax.conv_general_dilated(
        x_nc, w, window_strides=(stride,) * 3, padding=[(pad, pad)] * 3,
        dimension_numbers=("NCDHW", "OIDHW", "NCDHW"))
    out = out + b.reshape(1, -1, 1, 1, 1)
    return jnp.transpose(out, (0, 2, 3, 4, 1))


def reference_forward(x_ncdhw, params, channels, strides, in_channels, k=3):
    x = jnp.transpose(x_ncdhw, (0, 2, 3, 4, 1)).astype(jnp.float32)
    pad = (k - 1) // 2
    cin = in_channels
    for p, cout, s in zip(params, channels, strides):
        cx = _conv3d_ref(x, p["w"], p["b"], s, pad)
        mean = jnp.mean(cx, axis=(1, 2, 3), keepdims=True)
        var = jnp.mean((cx - mean) ** 2, axis=(1, 2, 3), keepdims=True)
        xn = (cx - mean) * jax.lax.rsqrt(var + 1e-5)
        y = jnp.where(xn >= 0, xn, p["alpha"] * xn)
        if s != 1 or cin != cout:
            if s == 1:
                res = _conv3d_ref(x, p["rw"], p["rb"], 1, 0)
            else:
                res = _conv3d_ref(x, p["rw"], p["rb"], s, pad)
        else:
            res = x
        x = y + res
        cin = cout
    B, Ho, Wo, Do, C = x.shape
    return x.reshape(B, Ho * Wo * Do, C)


# ----------------------------- main -------------------------------------------------------

if __name__ == "__main__":
    B, Cin, H = 2, 4, 16
    channels = (8, 16, 32)
    strides = (2, 2, 2)

    key = jax.random.PRNGKey(0)
    kx, kp = jax.random.split(key)
    x = jax.random.normal(kx, (B, Cin, H, H, H), jnp.float32)   # NCDHW, like PyTorch
    params = init_encoder_params(kp, Cin, channels, strides)

    out = unet3d_encoder_forward(x, params, channels, strides, Cin)
    out = jax.block_until_ready(out)

    assert out.shape == (B, (H // 8) ** 3, channels[-1]), out.shape  # (2, 8, 32)

    ref = reference_forward(x, params, channels, strides, Cin)
    np.testing.assert_allclose(np.asarray(out), np.asarray(ref), rtol=5e-2, atol=5e-2)

    print("KERNEL_OK")
</pallas_src>

<mosaic_0001>
module attributes {stable_mosaic.version = 11 : i64} {
  func.func @_fused_block_kernel(%arg0: i32, %arg1: memref<36x9x72xbf16, #tpu.memory_space<vmem>>, %arg2: memref<9x72x128xbf16, #tpu.memory_space<vmem>>, %arg3: memref<64x64xf32, #tpu.memory_space<vmem>>, %arg4: memref<1x64xf32, #tpu.memory_space<vmem>>, %arg5: memref<1x64x64xbf16, #tpu.memory_space<vmem>>) attributes {dimension_semantics = [#tpu.dimension_semantics<parallel>], iteration_bounds = array<i64: 2>, scalar_prefetch = 0 : i64, scratch_operands = 0 : i64, tpu.core_type = #tpu.core_type<tc>, window_params = [{transform_indices = @transform_0, window_bounds = array<i64: 36, 9, 72>}, {pipeline_mode = #tpu.pipeline_mode<synchronous>, transform_indices = @transform_1, window_bounds = array<i64: 9, 72, 128>}, {pipeline_mode = #tpu.pipeline_mode<synchronous>, transform_indices = @transform_2, window_bounds = array<i64: 64, 64>}, {pipeline_mode = #tpu.pipeline_mode<synchronous>, transform_indices = @transform_3, window_bounds = array<i64: 1, 64>}, {transform_indices = @transform_4, window_bounds = array<i64: 1, 64, 64>}]} {
    %cst = arith.constant 0.000000e+00 : f32
    %0 = vector.broadcast %cst : f32 to vector<64x128xf32>
    %c0 = arith.constant 0 : index
    %c0_0 = arith.constant 0 : index
    %c0_1 = arith.constant 0 : index
    %1 = vector.load %arg1[%c0, %c0_0, %c0_1] : memref<36x9x72xbf16, #tpu.memory_space<vmem>>, vector<8x8x72xbf16>
    %2 = vector.shape_cast %1 : vector<8x8x72xbf16> to vector<64x72xbf16>
    %c0_2 = arith.constant 0 : index
    %c0_3 = arith.constant 0 : index
    %c0_4 = arith.constant 0 : index
    %3 = vector.load %arg2[%c0_2, %c0_3, %c0_4] : memref<9x72x128xbf16, #tpu.memory_space<vmem>>, vector<1x72x128xbf16>
    %4 = vector.shape_cast %3 : vector<1x72x128xbf16> to vector<72x128xbf16>
    %cst_5 = arith.constant dense<0.000000e+00> : vector<64x128xf32>
    %5 = tpu.matmul %2, %4, %cst_5 {dimension_numbers = #tpu.dot_dimension_numbers<[1], [0], [0], [1], [0, 0, 1, 1], [], []>} : vector<64x72xbf16>, vector<72x128xbf16>, vector<64x128xf32> -> vector<64x128xf32>
    %6 = arith.addf %0, %5 : vector<64x128xf32>
    %c9 = arith.constant 9 : index
    %c0_6 = arith.constant 0 : index
    %c0_7 = arith.constant 0 : index
    %7 = vector.load %arg1[%c9, %c0_6, %c0_7] : memref<36x9x72xbf16, #tpu.memory_space<vmem>>, vector<8x8x72xbf16>
    %8 = vector.shape_cast %7 : vector<8x8x72xbf16> to vector<64x72xbf16>
    %c1 = arith.constant 1 : index
    %c0_8 = arith.constant 0 : index
    %c0_9 = arith.constant 0 : index
    %9 = vector.load %arg2[%c1, %c0_8, %c0_9] : memref<9x72x128xbf16, #tpu.memory_space<vmem>>, vector<1x72x128xbf16>
    %10 = vector.shape_cast %9 : vector<1x72x128xbf16> to vector<72x128xbf16>
    %cst_10 = arith.constant dense<0.000000e+00> : vector<64x128xf32>
    %11 = tpu.matmul %8, %10, %cst_10 {dimension_numbers = #tpu.dot_dimension_numbers<[1], [0], [0], [1], [0, 0, 1, 1], [], []>} : vector<64x72xbf16>, vector<72x128xbf16>, vector<64x128xf32> -> vector<64x128xf32>
    %12 = arith.addf %6, %11 : vector<64x128xf32>
    %c0_11 = arith.constant 0 : index
    %c1_12 = arith.constant 1 : index
    %c0_13 = arith.constant 0 : index
    %13 = vector.load %arg1[%c0_11, %c1_12, %c0_13] : memref<36x9x72xbf16, #tpu.memory_space<vmem>>, vector<8x8x72xbf16>
    %14 = vector.shape_cast %13 : vector<8x8x72xbf16> to vector<64x72xbf16>
    %c2 = arith.constant 2 : index
    %c0_14 = arith.constant 0 : index
    %c0_15 = arith.constant 0 : index
    %15 = vector.load %arg2[%c2, %c0_14, %c0_15] : memref<9x72x128xbf16, #tpu.memory_space<vmem>>, vector<1x72x128xbf16>
    %16 = vector.shape_cast %15 : vector<1x72x128xbf16> to vector<72x128xbf16>
    %cst_16 = arith.constant dense<0.000000e+00> : vector<64x128xf32>
    %17 = tpu.matmul %14, %16, %cst_16 {dimension_numbers = #tpu.dot_dimension_numbers<[1], [0], [0], [1], [0, 0, 1, 1], [], []>} : vector<64x72xbf16>, vector<72x128xbf16>, vector<64x128xf32> -> vector<64x128xf32>
    %18 = arith.addf %12, %17 : vector<64x128xf32>
    %c18 = arith.constant 18 : index
    %c0_17 = arith.constant 0 : index
    %c0_18 = arith.constant 0 : index
    %19 = vector.load %arg1[%c18, %c0_17, %c0_18] : memref<36x9x72xbf16, #tpu.memory_space<vmem>>, vector<8x8x72xbf16>
    %20 = vector.shape_cast %19 : vector<8x8x72xbf16> to vector<64x72xbf16>
    %c3 = arith.constant 3 : index
    %c0_19 = arith.constant 0 : index
    %c0_20 = arith.constant 0 : index
    %21 = vector.load %arg2[%c3, %c0_19, %c0_20] : memref<9x72x128xbf16, #tpu.memory_space<vmem>>, vector<1x72x128xbf16>
    %22 = vector.shape_cast %21 : vector<1x72x128xbf16> to vector<72x128xbf16>
    %cst_21 = arith.constant dense<0.000000e+00> : vector<64x128xf32>
    %23 = tpu.matmul %20, %22, %cst_21 {dimension_numbers = #tpu.dot_dimension_numbers<[1], [0], [0], [1], [0, 0, 1, 1], [], []>} : vector<64x72xbf16>, vector<72x128xbf16>, vector<64x128xf32> -> vector<64x128xf32>
    %24 = arith.addf %18, %23 : vector<64x128xf32>
    %c27 = arith.constant 27 : index
    %c0_22 = arith.constant 0 : index
    %c0_23 = arith.constant 0 : index
    %25 = vector.load %arg1[%c27, %c0_22, %c0_23] : memref<36x9x72xbf16, #tpu.memory_space<vmem>>, vector<8x8x72xbf16>
    %26 = vector.shape_cast %25 : vector<8x8x72xbf16> to vector<64x72xbf16>
    %c4 = arith.constant 4 : index
    %c0_24 = arith.constant 0 : index
    %c0_25 = arith.constant 0 : index
    %27 = vector.load %arg2[%c4, %c0_24, %c0_25] : memref<9x72x128xbf16, #tpu.memory_space<vmem>>, vector<1x72x128xbf16>
    %28 = vector.shape_cast %27 : vector<1x72x128xbf16> to vector<72x128xbf16>
    %cst_26 = arith.constant dense<0.000000e+00> : vector<64x128xf32>
    %29 = tpu.matmul %26, %28, %cst_26 {dimension_numbers = #tpu.dot_dimension_numbers<[1], [0], [0], [1], [0, 0, 1, 1], [], []>} : vector<64x72xbf16>, vector<72x128xbf16>, vector<64x128xf32> -> vector<64x128xf32>
    %30 = arith.addf %24, %29 : vector<64x128xf32>
    %c18_27 = arith.constant 18 : index
    %c1_28 = arith.constant 1 : index
    %c0_29 = arith.constant 0 : index
    %31 = vector.load %arg1[%c18_27, %c1_28, %c0_29] : memref<36x9x72xbf16, #tpu.memory_space<vmem>>, vector<8x8x72xbf16>
    %32 = vector.shape_cast %31 : vector<8x8x72xbf16> to vector<64x72xbf16>
    %c5 = arith.constant 5 : index
    %c0_30 = arith.constant 0 : index
    %c0_31 = arith.constant 0 : index
    %33 = vector.load %arg2[%c5, %c0_30, %c0_31] : memref<9x72x128xbf16, #tpu.memory_space<vmem>>, vector<1x72x128xbf16>
    %34 = vector.shape_cast %33 : vector<1x72x128xbf16> to vector<72x128xbf16>
    %cst_32 = arith.constant dense<0.000000e+00> : vector<64x128xf32>
    %35 = tpu.matmul %32, %34, %cst_32 {dimension_numbers = #tpu.dot_dimension_numbers<[1], [0], [0], [1], [0, 0, 1, 1], [], []>} : vector<64x72xbf16>, vector<72x128xbf16>, vector<64x128xf32> -> vector<64x128xf32>
    %36 = arith.addf %30, %35 : vector<64x128xf32>
    %c1_33 = arith.constant 1 : index
    %c0_34 = arith.constant 0 : index
    %c0_35 = arith.constant 0 : index
    %37 = vector.load %arg1[%c1_33, %c0_34, %c0_35] : memref<36x9x72xbf16, #tpu.memory_space<vmem>>, vector<8x8x72xbf16>
    %38 = vector.shape_cast %37 : vector<8x8x72xbf16> to vector<64x72xbf16>
    %c6 = arith.constant 6 : index
    %c0_36 = arith.constant 0 : index
    %c0_37 = arith.constant 0 : index
    %39 = vector.load %arg2[%c6, %c0_36, %c0_37] : memref<9x72x128xbf16, #tpu.memory_space<vmem>>, vector<1x72x128xbf16>
    %40 = vector.shape_cast %39 : vector<1x72x128xbf16> to vector<72x128xbf16>
    %cst_38 = arith.constant dense<0.000000e+00> : vector<64x128xf32>
    %41 = tpu.matmul %38, %40, %cst_38 {dimension_numbers = #tpu.dot_dimension_numbers<[1], [0], [0], [1], [0, 0, 1, 1], [], []>} : vector<64x72xbf16>, vector<72x128xbf16>, vector<64x128xf32> -> vector<64x128xf32>
    %42 = arith.addf %36, %41 : vector<64x128xf32>
    %c10 = arith.constant 10 : index
    %c0_39 = arith.constant 0 : index
    %c0_40 = arith.constant 0 : index
    %43 = vector.load %arg1[%c10, %c0_39, %c0_40] : memref<36x9x72xbf16, #tpu.memory_space<vmem>>, vector<8x8x72xbf16>
    %44 = vector.shape_cast %43 : vector<8x8x72xbf16> to vector<64x72xbf16>
    %c7 = arith.constant 7 : index
    %c0_41 = arith.constant 0 : index
    %c0_42 = arith.constant 0 : index
    %45 = vector.load %arg2[%c7, %c0_41, %c0_42] : memref<9x72x128xbf16, #tpu.memory_space<vmem>>, vector<1x72x128xbf16>
    %46 = vector.shape_cast %45 : vector<1x72x128xbf16> to vector<72x128xbf16>
    %cst_43 = arith.constant dense<0.000000e+00> : vector<64x128xf32>
    %47 = tpu.matmul %44, %46, %cst_43 {dimension_numbers = #tpu.dot_dimension_numbers<[1], [0], [0], [1], [0, 0, 1, 1], [], []>} : vector<64x72xbf16>, vector<72x128xbf16>, vector<64x128xf32> -> vector<64x128xf32>
    %48 = arith.addf %42, %47 : vector<64x128xf32>
    %c1_44 = arith.constant 1 : index
    %c1_45 = arith.constant 1 : index
    %c0_46 = arith.constant 0 : index
    %49 = vector.load %arg1[%c1_44, %c1_45, %c0_46] : memref<36x9x72xbf16, #tpu.memory_space<vmem>>, vector<8x8x72xbf16>
    %50 = vector.shape_cast %49 : vector<8x8x72xbf16> to vector<64x72xbf16>
    %c8 = arith.constant 8 : index
    %c0_47 = arith.constant 0 : index
    %c0_48 = arith.constant 0 : index
    %51 = vector.load %arg2[%c8, %c0_47, %c0_48] : memref<9x72x128xbf16, #tpu.memory_space<vmem>>, vector<1x72x128xbf16>
    %52 = vector.shape_cast %51 : vector<1x72x128xbf16> to vector<72x128xbf16>
    %cst_49 = arith.constant dense<0.000000e+00> : vector<64x128xf32>
    %53 = tpu.matmul %50, %52, %cst_49 {dimension_numbers = #tpu.dot_dimension_numbers<[1], [0], [0], [1], [0, 0, 1, 1], [], []>} : vector<64x72xbf16>, vector<72x128xbf16>, vector<64x128xf32> -> vector<64x128xf32>
    %54 = arith.addf %48, %53 : vector<64x128xf32>
    %55 = vector.extract_strided_slice %54 {offsets = [0, 0], sizes = [64, 64], strides = [1, 1]} : vector<64x128xf32> to vector<64x64xf32>
    %56 = vector.extract_strided_slice %54 {offsets = [0, 64], sizes = [64, 64], strides = [1, 1]} : vector<64x128xf32> to vector<64x64xf32>
    %c0_50 = arith.constant 0 : index
    %c0_51 = arith.constant 0 : index
    %57 = vector.load %arg4[%c0_50, %c0_51] : memref<1x64xf32, #tpu.memory_space<vmem>>, vector<1x64xf32>
    %58 = vector.broadcast %57 : vector<1x64xf32> to vector<64x64xf32>
    %59 = arith.addf %56, %58 : vector<64x64xf32>
    %cst_52 = arith.constant dense<0.000000e+00> : vector<64xf32>
    %60 = vector.multi_reduction <add>, %55, %cst_52 [0] : vector<64x64xf32> to vector<64xf32>
    %61 = vector.shape_cast %60 : vector<64xf32> to vector<1x64xf32>
    %62 = arith.mulf %55, %55 : vector<64x64xf32>
    %cst_53 = arith.constant dense<0.000000e+00> : vector<64xf32>
    %63 = vector.multi_reduction <add>, %62, %cst_53 [0] : vector<64x64xf32> to vector<64xf32>
    %64 = vector.shape_cast %63 : vector<64xf32> to vector<1x64xf32>
    %c0_54 = arith.constant 0 : index
    %c0_55 = arith.constant 0 : index
    %65 = vector.load %arg3[%c0_54, %c0_55] : memref<64x64xf32, #tpu.memory_space<vmem>>, vector<64x64xf32>
    %cst_56 = arith.constant dense<0.000000e+00> : vector<1x64xf32>
    %66 = tpu.matmul %61, %65, %cst_56 {dimension_numbers = #tpu.dot_dimension_numbers<[1], [0], [0], [1], [0, 0, 1, 1], [], []>} : vector<1x64xf32>, vector<64x64xf32>, vector<1x64xf32> -> vector<1x64xf32>
    %cst_57 = arith.constant 0.001953125 : f32
    %67 = vector.broadcast %cst_57 : f32 to vector<1x64xf32>
    %68 = arith.mulf %66, %67 : vector<1x64xf32>
    %c0_58 = arith.constant 0 : index
    %c0_59 = arith.constant 0 : index
    %69 = vector.load %arg3[%c0_58, %c0_59] : memref<64x64xf32, #tpu.memory_space<vmem>>, vector<64x64xf32>
    %cst_60 = arith.constant dense<0.000000e+00> : vector<1x64xf32>
    %70 = tpu.matmul %64, %69, %cst_60 {dimension_numbers = #tpu.dot_dimension_numbers<[1], [0], [0], [1], [0, 0, 1, 1], [], []>} : vector<1x64xf32>, vector<64x64xf32>, vector<1x64xf32> -> vector<1x64xf32>
    %cst_61 = arith.constant 0.001953125 : f32
    %71 = vector.broadcast %cst_61 : f32 to vector<1x64xf32>
    %72 = arith.mulf %70, %71 : vector<1x64xf32>
    %73 = arith.mulf %68, %68 : vector<1x64xf32>
    %74 = arith.subf %72, %73 : vector<1x64xf32>
    %cst_62 = arith.constant 0.000000e+00 : f32
    %75 = vector.broadcast %cst_62 : f32 to vector<1x64xf32>
    %76 = arith.maximumf %74, %75 : vector<1x64xf32>
    %77 = vector.broadcast %68 : vector<1x64xf32> to vector<64x64xf32>
    %78 = arith.subf %55, %77 : vector<64x64xf32>
    %cst_63 = arith.constant 9.99999974E-6 : f32
    %79 = vector.broadcast %cst_63 : f32 to vector<1x64xf32>
    %80 = arith.addf %76, %79 : vector<1x64xf32>
    %81 = math.rsqrt %80 : vector<1x64xf32>
    %82 = vector.broadcast %81 : vector<1x64xf32> to vector<64x64xf32>
    %83 = arith.mulf %78, %82 : vector<64x64xf32>
    %cst_64 = arith.constant 0.000000e+00 : f32
    %84 = vector.broadcast %cst_64 : f32 to vector<64x64xf32>
    %85 = arith.cmpf oge, %83, %84 : vector<64x64xf32>
    %cst_65 = arith.constant 2.500000e-01 : f32
    %86 = vector.broadcast %cst_65 : f32 to vector<64x64xf32>
    %87 = arith.mulf %86, %83 : vector<64x64xf32>
    %88 = arith.select %85, %83, %87 : vector<64x64xi1>, vector<64x64xf32>
    %89 = arith.addf %88, %59 : vector<64x64xf32>
    %90 = arith.truncf %89 : vector<64x64xf32> to vector<64x64xbf16>
    %c0_66 = arith.constant 0 : index
    %c0_67 = arith.constant 0 : index
    %c0_68 = arith.constant 0 : index
    %91 = vector.load %arg5[%c0_66, %c0_67, %c0_68] : memref<1x64x64xbf16, #tpu.memory_space<vmem>>, vector<1x64x64xbf16>
    %92 = vector.shape_cast %91 : vector<1x64x64xbf16> to vector<64x64xbf16>
    %93 = vector.shape_cast %90 : vector<64x64xbf16> to vector<1x64x64xbf16>
    tpu.vector_store %arg5[%c0_66, %c0_67, %c0_68], %93 {strides = array<i32>} : memref<1x64x64xbf16, #tpu.memory_space<vmem>>, vector<1x64x64xbf16>,
    return
  }
  func.func @transform_0(%arg0: i32) -> (i32, i32, i32) {
    %c0_i32 = arith.constant 0 : i32
    %c0_i32_0 = arith.constant 0 : i32
    %c0_i32_1 = arith.constant 0 : i32
    return %arg0, %c0_i32, %c0_i32_0 : i32, i32, i32
  }
  func.func @transform_1(%arg0: i32) -> (i32, i32, i32) {
    %c0_i32 = arith.constant 0 : i32
    %c0_i32_0 = arith.constant 0 : i32
    %c0_i32_1 = arith.constant 0 : i32
    %c0_i32_2 = arith.constant 0 : i32
    return %c0_i32, %c0_i32_0, %c0_i32_1 : i32, i32, i32
  }
  func.func @transform_2(%arg0: i32) -> (i32, i32) {
    %c0_i32 = arith.constant 0 : i32
    %c0_i32_0 = arith.constant 0 : i32
    %c0_i32_1 = arith.constant 0 : i32
    return %c0_i32, %c0_i32_0 : i32, i32
  }
  func.func @transform_3(%arg0: i32) -> (i32, i32) {
    %c0_i32 = arith.constant 0 : i32
    %c0_i32_0 = arith.constant 0 : i32
    %c0_i32_1 = arith.constant 0 : i32
    return %c0_i32, %c0_i32_0 : i32, i32
  }
  func.func @transform_4(%arg0: i32) -> (i32, i32, i32) {
    %c0_i32 = arith.constant 0 : i32
    %c0_i32_0 = arith.constant 0 : i32
    %c0_i32_1 = arith.constant 0 : i32
    return %arg0, %c0_i32, %c0_i32_0 : i32, i32, i32
  }
}

</mosaic_0001>

<bundles_post_ra>
// kernel: tpu_custom_call.1
= control target key start
LH: loop header
LB: loop body
LE: loop exit
PB: predicated region body
PF: predicated region fallthrough
CT: control target
= control target key end

     0   :  { %9 = vsyncpa [#allocation3], 0  ;;  %s4043_s0 = inlined_call_operand.hbm [shape: bf16[72,9,72], index: 0, kind: input, shape index: {}]   ;;  %s4044_s1 = inlined_call_operand.hbm [shape: bf16[9,72,128], index: 1, kind: input, shape index: {}]   ;;  %s4045_s2 = inlined_call_operand.hbm [shape: f32[64,64], index: 2, kind: input, shape index: {}]   ;;  %s4046_s3 = inlined_call_operand.hbm [shape: f32[1,64], index: 3, kind: input, shape index: {}]   ;;  %s4047_s4 = inlined_call_operand.hbm [shape: bf16[2,64,64], index: 4, kind: output, shape index: {}]  }
   0x1   :  { %11 = vsyncpa [#allocation3 + $0x1], 0 }
   0x2   :  { %12 = vsyncpa [#allocation6], 0 }
   0x3   :  { %13 = vsyncpa [#allocation9], 0 }
   0x4   :  { %14 = vsyncpa [#allocation4], 0 }
   0x5   :  { %16 = vsyncpa [#allocation4 + $0x1], 0  ;;  %s3455_s15 = smov 0   ;;  %s3457_s16 = smov 0  }
   0x6   :  { %s3459_s17 = smov 0   ;;  %s3461_s18 = smov 0  }
   0x7 LB: > { %s3476_s19 = sadd.s32 4294967295, %s3414_s18   ;;  %s2441_s20 = sadd.s32 4294967294, %s3414_s18   ;;  %s3414_s18 = sphi %s3461_s18, %s4074_s18   ;;  %s3410_s17 = sphi %s3459_s17, %s4073_s17   ;;  %s3406_s16 = sphi %s3457_s16, %s4072_s16   ;;  %s3402_s15 = sphi %s3455_s15, %s4071_s15  }
   0x8   : > { %p42_p0 = scmp.ne.s32.totalorder %s3406_s16, %s3402_s15  ;;  %p4048_p1 = scmp.eq.s32.totalorder %s3476_s19, 0 }
   0x9   : > { %p135_p3 = scmp.eq.s32.totalorder %s2441_s20, 1  ;;  %p2442_p5 = scmp.ge.s32.totalorder %s3414_s18, 1 }
   0xa   : > { %p3485_p4 = por %p4048_p1, %p42_p0  ;;  %p142_p7 = scmp.lt.s32.totalorder %s3414_s18, 3 }
   0xb   : > { %p3490_p6 = por %p135_p3, %p42_p0  ;;  %s3416_s24 = smov [#allocation5]  }
   0xc   : > { %s4052_s21 = scalar_select %p3485_p4, 1, 0 }
   0xd   : > { %s4053_s22 = scalar_select %p3490_p6, 1, 0 }
   0xe   : > { %p3495_p8 = pnand %p2442_p5, %p142_p7  ;;  %s154_s25 = sshll.u32 %s3416_s24, 4  ;;  %s3499_s25 = int_to_ptr.vmem [resolvable:$true] %s154_s25 }
   0xf   : > { %s3417_s27 = smov [#allocation7]   ;;  %s3226_s5 = scalar_lea.hbm %s4044_s1, 5184 }
  0x10   : > { %s4054_s23 = scalar_select %p3495_p8, 1, 0 }
  0x11   : > { %p3085_p9 = pneg %p3495_p8  ;;  %s167_s28 = sshll.u32 %s3417_s27, 4  ;;  %s3510_s28 = int_to_ptr.vmem [resolvable:$true] %s167_s28 }
  0x12   : > { %p3227_p12 = scmp.ne.s32.totalorder %s4044_s1, %s3226_s5  ;;  %p3233_p5 = scmp.lt.u32.totalorder %s3226_s5, %s4044_s1 }
  0x13   : > { %p3506_p11 = pnand %p3085_p9, %p4048_p1 }
  0x15   : > { %p3520_p13 = pneg %p3506_p11 }
  0x17   : > { %p3229_p0 = pnand %p3520_p13, %p3227_p12 }
  0x19   : > { %p3230_p3 = pneg %p3229_p0 }
  0x1b   : > { %p3235_p7 = pnand %p3233_p5, %p3230_p3 }
  0x1d   : > { %3238 = shalt.err (!%p3235_p7)
}
  0x1e   : > { %s3239_s11 = scalar_lea.vmem %s3499_s25, 5184  ;;  %p3247_p2 = scmp.lt.s32.totalorder %s3499_s25, %s3499_s25 }
  0x1f   : > { %p3240_p9 = scmp.ne.s32.totalorder %s3499_s25, %s3239_s11  ;;  %p3248_p6 = scmp.lt.s32.totalorder %s3239_s11, %s3239_s11 }
  0x21   : > { %p3242_p10 = pnand %p3240_p9, %p3520_p13  ;;  %p3249_p12 = por %p3248_p6, %p3247_p2 }
  0x23   : > { %p3243_p1 = pneg %p3242_p10 }
  0x25   : > { %p3250_p0 = pnand %p3249_p12, %p3243_p1 }
  0x27   : > { %3253 = shalt.err (!%p3250_p0)
}
  0x28   : > { %s4049_s12 = smov 64   ;;  %s3419_s13 = smov 4  }
  0x29   : > { %3088 = dma.hbm_to_vmem [thread:$0]  (!%p3506_p11), %s4044_s1, 5184, %s3499_s25, [#allocation6], %s4049_s12, %s4049_s12, %s3419_s13  }
  0x2a   : > { %s3254_s29 = scalar_lea.hbm %s4045_s2, 1024 }
  0x2b   : > { %p3255_p1 = scmp.ne.s32.totalorder %s4045_s2, %s3254_s29  ;;  %p3261_p10 = scmp.lt.u32.totalorder %s3254_s29, %s4045_s2 }
  0x2d   : > { %p3257_p2 = pnand %p3255_p1, %p3520_p13 }
  0x2f   : > { %p3258_p6 = pneg %p3257_p2 }
  0x31   : > { %p3263_p3 = pnand %p3261_p10, %p3258_p6 }
  0x33   : > { %3266 = shalt.err (!%p3263_p3)
}
  0x34   : > { %s3267_s25 = scalar_lea.vmem %s3510_s28, 1024  ;;  %p3275_p12 = scmp.lt.s32.totalorder %s3510_s28, %s3510_s28 }
  0x35   : > { %p3268_p5 = scmp.ne.s32.totalorder %s3510_s28, %s3267_s25  ;;  %p3276_p0 = scmp.lt.s32.totalorder %s3267_s25, %s3267_s25 }
  0x37   : > { %p3270_p7 = pnand %p3268_p5, %p3520_p13  ;;  %p3277_p1 = por %p3276_p0, %p3275_p12 }
  0x39   : > { %p3271_p9 = pneg %p3270_p7 }
  0x3b   : > { %p3278_p2 = pnand %p3277_p1, %p3271_p9 }
  0x3d   : > { %3281 = shalt.err (!%p3278_p2)
}
  0x3e   : > { %s3420_s9 = smov 128   ;;  %s3421_s10 = smov 8  }
  0x3f   : > { %3091 = dma.hbm_to_vmem [thread:$0]  (!%p3506_p11), %s4045_s2, 1024, %s3510_s28, [#allocation6], %s3420_s9, %s3420_s9, %s3421_s10  }
  0x40   : > { %s3422_s20 = smov [#allocation8]   ;;  %s3568_s27 = sadd.s32 1, %s3414_s18  }
  0x41   : > { %s181_s24 = sshll.u32 %s3422_s20, 4  ;;  %s3282_s5 = scalar_lea.hbm %s4046_s3, 16  ;;  %s182_s24 = int_to_ptr.vmem [resolvable:$true] %s181_s24 }
  0x42   : > { %p3283_p6 = scmp.ne.s32.totalorder %s4046_s3, %s3282_s5  ;;  %p3289_p5 = scmp.lt.u32.totalorder %s3282_s5, %s4046_s3 }
  0x44   : > { %p3285_p10 = pnand %p3283_p6, %p3520_p13 }
  0x46   : > { %p3286_p3 = pneg %p3285_p10 }
  0x48   : > { %p3291_p7 = pnand %p3289_p5, %p3286_p3 }
  0x4a   : > { %3294 = shalt.err (!%p3291_p7)
}
  0x4b   : > { %s3295_s28 = scalar_lea.vmem %s182_s24, 16  ;;  %s3302_s9 = scalar_lea.vmem %s182_s24, 32 }
  0x4c   : > { %p3296_p9 = scmp.ne.s32.totalorder %s182_s24, %s3295_s28  ;;  %p3303_p1 = scmp.lt.s32.totalorder %s182_s24, %s182_s24 }
  0x4d   : > { %p3304_p2 = scmp.lt.s32.totalorder %s3302_s9, %s3295_s28 }
  0x4e   : > { %p3298_p12 = pnand %p3296_p9, %p3520_p13 }
  0x4f   : > { %p3305_p4 = por %p3304_p2, %p3303_p1 }
  0x50   : > { %p3299_p0 = pneg %p3298_p12 }
  0x52   : > { %p3306_p8 = pnand %p3305_p4, %p3299_p0 }
  0x54   : > { %3309 = shalt.err (!%p3306_p8)
}
  0x55   : > { %3094 = dma.hbm_to_vmem [thread:$0]  (!%p3506_p11), %s4046_s3, 16, %s182_s24, [#allocation9]  }
  0x56   : > { %s26_s8 = ssub.s32 %s3414_s18, %s3568_s27  ;;  %s29_s12 = sadd.s32 1, %s3410_s17 }
  0x57   : > { %p27_p4 = scmp.eq.s32.totalorder %s26_s8, 0  ;;  %p36_p8 = scmp.ne.s32.totalorder %s3410_s17, %s3406_s16 }
  0x58   : > { %p37_p13 = scmp.eq.s32.totalorder %s3414_s18, 0  ;;  %p3106_p6 = scmp.lt.s32.totalorder %s3414_s18, 2 }
  0x59   : > { %s3596_s26 = scalar_select %p27_p4, %s3410_s17, %s29_s12  }
  0x5a   : > { %p38_p10 = por %p37_p13, %p36_p8  ;;  %p4057_p3 = scmp.eq.s32.totalorder %s3476_s19, 1 }
  0x5b   : > { %s192_s20 = sand.u32 1, %s3410_s17   ;;  %s2670_s29 = smul.u32 4608, %s3414_s18 }
  0x5c   : > { %p3600_p5 = por %p4057_p3, %p36_p8  ;;  %s3067_s30 = smul.u32 288, %s192_s20 }
  0x5d   : > { %p3606_p7 = pnand %p3106_p6, %p38_p10  ;;  %s3613_s7 = scalar_lea.hbm %s4043_s0, %s2670_s29 }
  0x5e   : > { %s196_s25 = scalar_lea.vmem [#allocation2], %s3067_s30  ;;  %s3617_s9 = scalar_lea.sflag [#allocation3], %s192_s20 }
  0x5f   : > { %s204_s28 = sshll.u32 %s196_s25, 4  ;;  %s3310_s10 = scalar_lea.hbm %s3613_s7, 4608  ;;  %s3615_s28 = int_to_ptr.vmem [resolvable:$true] %s204_s28 }
  0x60   : > { %p3311_p11 = scmp.ne.s32.totalorder %s3613_s7, %s3310_s10  ;;  %p3312_p9 = pneg %p3606_p7 }
  0x61   : > { %s3315_s12 = scalar_lea.hbm %s4043_s0, 9216  ;;  %p3316_p1 = scmp.lt.u32.totalorder %s3613_s7, %s4043_s0 }
  0x62   : > { %p3313_p12 = pnand %p3312_p9, %p3311_p11  ;;  %p3317_p2 = scmp.lt.u32.totalorder %s3315_s12, %s3310_s10 }
  0x63   : > { %p3319_p8 = scmp.lt.u32.totalorder %s3310_s10, %s3613_s7 }
  0x64   : > { %p3314_p0 = pneg %p3313_p12  ;;  %p3318_p4 = por %p3317_p2, %p3316_p1 }
  0x66   : > { %p3320_p13 = por %p3319_p8, %p3318_p4 }
  0x68   : > { %p3321_p6 = pnand %p3320_p13, %p3314_p0 }
  0x6a   : > { %3324 = shalt.err (!%p3321_p6)
}
  0x6b   : > { %s3325_s20 = scalar_lea.vmem %s3615_s28, 4608  ;;  %s3423_s30 = smov [#allocation2]  }
  0x6c   : > { %p3326_p10 = scmp.ne.s32.totalorder %s3615_s28, %s3325_s20  ;;  %s3330_s6 = sshll.u32 %s3423_s30, 4  ;;  %s3331_s6 = int_to_ptr.vmem [resolvable:$false] %s3330_s6 }
  0x6d   : > { %s3332_s25 = scalar_lea.vmem %s3331_s6, 9216  ;;  %p3333_p12 = scmp.lt.s32.totalorder %s3615_s28, %s3331_s6 }
  0x6e   : > { %p3328_p3 = pnand %p3326_p10, %p3312_p9  ;;  %p3334_p1 = scmp.lt.s32.totalorder %s3332_s25, %s3325_s20 }
  0x70   : > { %p3329_p11 = pneg %p3328_p3  ;;  %p3335_p2 = por %p3334_p1, %p3333_p12 }
  0x72   : > { %p3336_p4 = pnand %p3335_p2, %p3329_p11 }
  0x74   : > { %3339 = shalt.err (!%p3336_p4)
}
  0x75   : > { %s4060_s10 = smov 64   ;;  %p4061_p9 = scmp.ne.s32.totalorder %s4054_s23, 0 }
  0x76   : > { %3098 = dma.hbm_to_vmem [thread:$0]  (!%p3606_p7), %s3613_s7, 4608, %s3615_s28, %s3617_s9, %s4060_s10, %s4060_s10, %s3419_s13  }
  0x77   : > { %216 = sbr.rel (%p4061_p9) target bundleno = 758 (0x2f6), region = 36  ;;  %s3651_s11 = sand.u32 (!%p4061_p9), 1, %s3406_s16  }
  0x78   : > { %s3068_s8 = smul.u32 (!%p4061_p9), 288, %s3651_s11  ;;  %s219_s12 = scalar_lea.sflag (!%p4061_p9), [#allocation3], %s3651_s11 }
  0x79   : > { %p4062_p0 = scmp.ne.s32.totalorder (!%p4061_p9), %s4052_s21, 0 }
  0x7a   : > { %s3655_s29 = scalar_lea.vmem (!%p4061_p9), [#allocation2], %s3068_s8 }
  0x7e   : > { %3385 = dma.done.wait (%p4062_p0), %s219_s12, 4608  }
  0x7f   : > { %3387 = vsyncadd (%p4062_p0), %s219_s12, 4294962688  ;;  %p4063_p7 = scmp.eq.s32.totalorder %s3476_s19, 0 }
  0x81   : > { %3389 = dma.done.wait (%p4063_p7), [#allocation6], 6208   ;;  %p4064_p8 = pmov %p4063_p7 }
  0x82   : > { %p4065_p13 = pmov %p4063_p7 }
  0x83   : > { %3391 = vsyncadd (%p4064_p8), [#allocation6], 4294961088 }
  0x84   : > { %3393 = dma.done.wait (%p4065_p13), [#allocation9], 16   ;;  %p4066_p6 = pmov %p4063_p7 }
  0x85   : > { %v3155_v0 = vld [vmem:[#allocation5 + $0x24] sm:$0xff]   ;;  %v3156_v1 = vld [vmem:[#allocation5 + $0x90] sm:$0xff]   ;;  %v3158_v3 = vld [vmem:[#allocation5 + $0x98] sm:$0xff]   ;;  %vm357_vm0 = vcmask 1043456   ;;  %vm344_vm1 = vcmask 588800   ;;  %s3424_s21 = smov 64  }
  0x86   : > { %3395 = vsyncadd (%p4066_p6), [#allocation9], 4294967280  ;;  %2770 = vmatprep.subr.bf16.mxu1 %v3155_v0  ;;  %v3157_v2 = vld [vmem:[#allocation5 + $0x2c] sm:$0xff]   ;;  %2842 = vmatprep.subr.bf16.mxu0 %v3156_v1  ;;  %v3159_v4 = vld [vmem:[#allocation5 + $0x34] sm:$0xff]   ;;  %vm569_vm2 = vsmask.f32 3328 }
  0x87   : > { %2771 = vmatpush3.bf16.msra.mxu1 %v3155_v0  ;;  %2843 = vmatpush3.bf16.msra.mxu0 %v3156_v1  ;;  %v3160_v5 = vld [vmem:[#allocation5 + $0xa0] sm:$0xff]   ;;  %v3162_v7 = vld [vmem:[#allocation5 + $0xa8] sm:$0xff]   ;;  %v3164_v10 = vld [vmem:[#allocation5 + $0xb0] ss:$0 sps:$4 sm:$0xff]   ;;  %vm570_vm3 = vsmask.f32 7440 }
  0x88   : > { %2772 = vmatprep.subr.bf16.mxu1 %v3157_v2  ;;  %2844 = vmatprep.subr.bf16.mxu0 %v3158_v3  ;;  %v3161_v6 = vld [vmem:[#allocation5 + $0x3c] sm:$0xff]   ;;  %v3163_v8 = vld [vmem:[#allocation5 + $0x44] ss:$0 sps:$4 sm:$0xff]   ;;  %v3165_v9 = vld [vmem:[%s3655_s29 + $0x48] ss:$8 sps:$4 sm:$0xff]   ;;  %v1054_v14 = vsel %vm357_vm0, %v3164_v10, 0 }
  0x89   : > { %v3167_v11 = vld [vmem:[%s3655_s29 + $0xd8] ss:$8 sps:$4 sm:$0xff]   ;;  %2780 = vmatprep.mubr.msk.bf16.mxu1 %vm344_vm1, %v3165_v9  ;;  %v359_v12 = vsel %vm357_vm0, %v3163_v8, 0  ;;  %v3170_v17 = vld [vmem:[%s3655_s29 + $0xe8] ss:$8 sps:$4 sm:$0xff]   ;;  %vm3702_vm4 = vmor %vm569_vm2, %vm570_vm3  ;;  %vm3426_vm5 = vmmov 0  }
  0x8a   : > { %2852 = vmatprep.mubr.msk.bf16.mxu0 %vm344_vm1, %v3167_v11  ;;  %v3166_v13 = vld [vmem:[#allocation5] sm:$0xff]   ;;  %v3168_v15 = vld [vmem:[#allocation5 + $0xb4] sm:$0xff]   ;;  %v3171_v18 = vld [vmem:[#allocation5 + $0x8] sm:$0xff]   ;;  %vm1984_vm6 = vcmask 523264   ;;  %vm2316_vm7 = vcmask 519168   ;;  %s2453_s23 = sshll.u32 %s3651_s11, 5 }
  0x8b   : > { %2773 = vmatpush3.bf16.msra.mxu1 %v3157_v2  ;;  %2845 = vmatpush3.bf16.msra.mxu0 %v3158_v3  ;;  %v3169_v16 = vld [vmem:[%s3655_s29 + $0x58] ss:$8 sps:$4 sm:$0xff]   ;;  %v3175_v20 = vld [vmem:[%s3655_s29 + $0x68] ss:$8 sps:$4 sm:$0xff]   ;;  %v3182_v29 = vld [vmem:[#allocation5 + $0xd4] ss:$0 sps:$4 sm:$0xff]  }
  0x8c   : > { %2774 = vmatprep.subr.bf16.mxu1 %v3159_v4  ;;  %2846 = vmatprep.subr.bf16.mxu0 %v3160_v5  ;;  %v3172_v19 = vld [vmem:[#allocation5 + $0xbc] sm:$0xff]   ;;  %v3173_v22 = vld [vmem:[#allocation5 + $0x10] sm:$0xff]   ;;  %v3174_v23 = vld [vmem:[#allocation5 + $0xc4] sm:$0xff]   ;;  %v1319_v45 = vsel %vm357_vm0, %v3182_v29, 0  ;;  %s2669_s13 = sshll.u32 %s3476_s19, 9  ;;  %s258_s5 = scalar_lea.vmem [#allocation10], %s2453_s23 }
  0x8d   : > { %v3177_v21 = vld [vmem:[%s3655_s29 + $0xf8] ss:$8 sps:$4 sm:$0xff]   ;;  %v3180_v26 = vld [vmem:[%s3655_s29 + $0x108] ss:$8 sps:$4 sm:$0xff]   ;;  %v2544_v32 = vld [vmem:[%s3655_s29 + $0x94] sm:$0x1]  ;;  %s3987_s19 = scalar_lea.hbm %s4047_s4, %s2669_s13 }
  0x8e   : > { %v3179_v24 = vld [vmem:[%s3655_s29 + $0x78] ss:$8 sps:$4 sm:$0xff]   ;;  %v3178_v27 = vld [vmem:[#allocation5 + $0xcc] sm:$0xff]   ;;  %v2546_v34 = vld [vmem:[%s3655_s29 + $0x9c] sm:$0x1]  ;;  %v1155_v37 = vshll.u32 %v2544_v32, 16 }
  0x8f   : > { %2775 = vmatpush3.bf16.msra.mxu1 %v3159_v4  ;;  %2847 = vmatpush3.bf16.msra.mxu0 %v3160_v5  ;;  %v3176_v25 = vld [vmem:[#allocation5 + $0x18] sm:$0xff]   ;;  %v3181_v28 = vld [vmem:[#allocation5 + $0x20] ss:$0 sps:$4 sm:$0xff]   ;;  %v2543_v31 = vld [vmem:[%s3655_s29 + $0x90] sm:$0xf]  ;;  %v1169_v40 = vshll.u32 %v2546_v34, 16 }
  0x90   : > { %2776 = vmatprep.subr.bf16.mxu1 %v3161_v6  ;;  %2848 = vmatprep.subr.bf16.mxu0 %v3162_v7  ;;  %v3183_v30 = vld [vmem:[%s3655_s29] ss:$8 sps:$4 sm:$0xff]   ;;  %v2545_v33 = vld [vmem:[%s3655_s29 + $0x98] sm:$0xf]  ;;  %v1146_v35 = vshrl.u32 %v2543_v31, 16  ;;  %v1149_v36 = vshll.u32 %v2543_v31, 16 }
  0x91   : > { %v1160_v38 = vshrl.u32 %v2545_v33, 16  ;;  %v1163_v39 = vshll.u32 %v2545_v33, 16  ;;  %v486_v41 = vsel %vm357_vm0, %v3181_v28, 0  ;;  %v1157_v46 = vrot.slane %v1155_v37, 5  ;;  %v2547_v50 = vld [vmem:[%s3655_s29 + $0xa0] sm:$0xf] }
  0x92   : > { %v1148_v42 = vrot.slane %v1146_v35, 4  ;;  %v1151_v43 = vrot.slane %v1149_v36, 5  ;;  %v1171_v48 = vrot.slane %v1169_v40, 5  ;;  %v2548_v51 = vld [vmem:[%s3655_s29 + $0xa4] sm:$0x1]  ;;  %v3184_v53 = vld [vmem:[#allocation5 + $0x48] sm:$0xff]  }
  0x93   : > { %2777 = vmatpush3.bf16.msra.mxu1 %v3161_v6  ;;  %2849 = vmatpush3.bf16.msra.mxu0 %v3162_v7  ;;  %v1162_v44 = vrot.slane %v1160_v38, 4  ;;  %v1165_v47 = vrot.slane %v1163_v39, 5  ;;  %v2549_v52 = vld [vmem:[%s3655_s29 + $0xa8] sm:$0xf]  ;;  %v2550_v56 = vld [vmem:[%s3655_s29 + $0xac] sm:$0x1] }
  0x94   : > { %3058 = vmatprep.subr.msk.bf16.mxu1 %vm357_vm0, %v3163_v8  ;;  %3062 = vmatprep.subr.msk.bf16.mxu0 %vm357_vm0, %v3164_v10  ;;  %v1152_v49 = vor.u32 %v1151_v43, %v1148_v42  ;;  %v1174_v57 = vshrl.u32 %v2547_v50, 16  ;;  %v1177_v58 = vshll.u32 %v2547_v50, 16  ;;  %v1183_v59 = vshll.u32 %v2548_v51, 16  ;;  %v3186_v61 = vld [vmem:[%s3655_s29 + $0x10] ss:$8 sps:$4 sm:$0xff]   ;;  %v3190_v35 = vld [vmem:[#allocation5 + $0xe8] sm:$0xff]  }
  0x95   : > { %v1166_v55 = vor.u32 %v1165_v47, %v1162_v44  ;;  %v1188_v62 = vshrl.u32 %v2549_v52, 16  ;;  %v1191_v63 = vshll.u32 %v2549_v52, 16  ;;  %v1197_v0 = vshll.u32 %v2550_v56, 16  ;;  %v3185_v2 = vld [vmem:[#allocation5 + $0xd8] sm:$0xff]   ;;  %v3192_v36 = vld [vmem:[#allocation5 + $0x60] sm:$0xff]   ;;  %s2339_s7 = sshll.u32 %s258_s5, 4  ;;  %s3989_s7 = int_to_ptr.vmem [resolvable:$true] %s2339_s7 }
  0x96   : > { %v1153_v60 = vrot.slane %v1152_v49, 4  ;;  %v1176_v3 = vrot.slane %v1174_v57, 4  ;;  %v1179_v4 = vrot.slane %v1177_v58, 5  ;;  %v1185_v6 = vrot.slane %v1183_v59, 5  ;;  %v3194_v42 = vld [vmem:[%s3655_s29 + $0x30] ss:$8 sps:$4 sm:$0xff]  }
  0x97   : > { %2779 = vmatpush3.bf16.msra.mxu1 %v359_v12  ;;  %2851 = vmatpush3.bf16.msra.mxu0 %v1054_v14  ;;  %v1167_v1 = vrot.slane %v1166_v55, 4  ;;  %v1190_v7 = vrot.slane %v1188_v62, 4  ;;  %v1193_v8 = vrot.slane %v1191_v63, 5  ;;  %v3187_v14 = vld [vmem:[#allocation5 + $0x50] sm:$0xff]   ;;  %v2555_v44 = vld [vmem:[%s3655_s29 + $0xc0] sm:$0xf] }
  0x98   : > { %2788 = vmatprep.subr.bf16.mxu1 %v3166_v13  ;;  %2860 = vmatprep.subr.bf16.mxu0 %v3168_v15  ;;  %v1158_v5 = vsel %vm3702_vm4, %v1153_v60, %v1157_v46  ;;  %v1180_v10 = vor.u32 %v1179_v4, %v1176_v3  ;;  %v2557_v46 = vld [vmem:[%s3655_s29 + $0xc8] sm:$0xf]  ;;  %v1230_v49 = vshrl.u32 %v2555_v44, 16  ;;  %v1233_v50 = vshll.u32 %v2555_v44, 16  ;;  %v3193_v62 = vld [vmem:[#allocation5 + $0xf0] sm:$0xff]   ;;  %s2326_s24 = scalar_lea.sflag [#allocation4], %s3651_s11 }
  0x99   : > { %v1172_v9 = vsel %vm3702_vm4, %v1167_v1, %v1171_v48  ;;  %v1194_v12 = vor.u32 %v1193_v8, %v1190_v7  ;;  %v2558_v48 = vld [vmem:[%s3655_s29 + $0xcc] sm:$0x1]  ;;  %v1247_v55 = vshll.u32 %v2557_v46, 16  ;;  %v3195_v60 = vld [vmem:[#allocation5 + $0x68] ss:$0 sps:$4 sm:$0xff]   ;;  %s3340_s20 = scalar_lea.vmem %s3989_s7, 512 }
  0x9a   : > { %2781 = vmatmul.mubr.msk.bf16.vlgmr.msra.gmra.mrb[0].mxu1 %vm344_vm1, %v3169_v16  ;;  %2853 = vmatmul.mubr.msk.bf16.vlgmr.msra.gmra.mrb[0].mxu0 %vm344_vm1, %v3170_v17  ;;  %v2559_v11 = vcombine.low %v1158_v5, %v1172_v9  ;;  %v3189_v17 = vld [vmem:[#allocation5 + $0x58] sm:$0xff]   ;;  %v1253_v56 = vshll.u32 %v2558_v48, 16  ;;  %v1232_v58 = vrot.slane %v1230_v49, 4  ;;  %v1235_v59 = vrot.slane %v1233_v50, 5  ;;  %v3738_v7 = vld [vmem:[#allocation5 + $0x6c] sm:$0xff]   ;;  %v2039_v54 = vld [vmem:[#allocation7 + $0x20] sm:$0xff]  ;;  %p3341_p10 = scmp.ne.s32.totalorder %s3989_s7, %s3340_s20 }
  0x9b   : > { %2789 = vmatpush3.bf16.msra.mxu1 %v3166_v13  ;;  %2861 = vmatpush3.bf16.msra.mxu0 %v3168_v15  ;;  %v1199_v13 = vrot.slane %v1197_v0, 5  ;;  %v1181_v15 = vrot.slane %v1180_v10, 4  ;;  %v1195_v16 = vrot.slane %v1194_v12, 4  ;;  %v1249_v0 = vrot.slane %v1247_v55, 5  ;;  %v3196_v5 = vld [vmem:[#allocation5 + $0xf8] ss:$0 sps:$4 sm:$0xff]  }
  0x9c   : > { %2790 = vmatprep.subr.bf16.mxu1 %v3171_v18  ;;  %2862 = vmatprep.subr.bf16.mxu0 %v3172_v19  ;;  %v1255_v4 = vrot.slane %v1253_v56, 5  ;;  %v554_v9 = vld [vmem:[%s3655_s29 + $0x4] sm:$0x1]  ;;  %v555_v10 = vld [vmem:[%s3655_s29 + $0x8] sm:$0xf]  ;;  %p3342_p3 = pnand %p3341_p10, %p3600_p5  ;;  %s3428_s30 = smov [#allocation10]  }
  0x9d   : > { %2784 = vmatprep.mubr.msk.bf16.mxu1 %vm344_vm1, %v3175_v20  ;;  %2856 = vmatprep.mubr.msk.bf16.mxu0 %vm344_vm1, %v3177_v21  ;;  %v2551_v20 = vld [vmem:[%s3655_s29 + $0xb0] sm:$0xf]  ;;  %v2552_v21 = vld [vmem:[%s3655_s29 + $0xb4] sm:$0x1]  ;;  %s3344_s6 = sshll.u32 %s3428_s30, 4  ;;  %s3345_s6 = int_to_ptr.vmem [resolvable:$false] %s3344_s6 }
  0x9e   : > { %p3343_p11 = pneg %p3342_p3  ;;  %s3346_s25 = scalar_lea.vmem %s3345_s6, 1024 }
  0x9f   : > { %2791 = vmatpush3.bf16.msra.mxu1 %v3171_v18  ;;  %2863 = vmatpush3.bf16.msra.mxu0 %v3172_v19  ;;  %v3191_v18 = vld [vmem:[%s3655_s29 + $0x20] ss:$8 sps:$4 sm:$0xff]   ;;  %v1186_v19 = vsel %vm3702_vm4, %v1181_v15, %v1185_v6  ;;  %p3347_p12 = scmp.lt.s32.totalorder %s3989_s7, %s3345_s6  ;;  %p3348_p1 = scmp.lt.s32.totalorder %s3346_s25, %s3340_s20 }
  0xa0   : > { %2792 = vmatprep.subr.bf16.mxu1 %v3173_v22  ;;  %2864 = vmatprep.subr.bf16.mxu0 %v3174_v23  ;;  %v553_v6 = vld [vmem:[%s3655_s29] sm:$0xf] }
  0xa1   : > { %v576_v15 = vshll.u32 %v553_v6, 16  ;;  %p3349_p2 = por %p3348_p1, %p3347_p12 }
  0xa2   : > { %2785 = vmatmul.mubr.msk.bf16.gmra.mrb[4].mxu1 %vm344_vm1, %v3179_v24  ;;  %2857 = vmatmul.mubr.msk.bf16.gmra.mrb[4].mxu0 %vm344_vm1, %v3180_v26  ;;  %v2554_v24 = vld [vmem:[%s3655_s29 + $0xbc] sm:$0x1]  ;;  %v1205_v26 = vshll.u32 %v2551_v20, 16 }
  0xa3   : > { %2793 = vmatpush3.bf16.msra.mxu1 %v3173_v22  ;;  %2865 = vmatpush3.bf16.msra.mxu0 %v3174_v23  ;;  %v1200_v22 = vsel %vm3702_vm4, %v1195_v16, %v1199_v13  ;;  %v2553_v23 = vld [vmem:[%s3655_s29 + $0xb8] sm:$0xf]  ;;  %v1225_v34 = vshll.u32 %v2554_v24, 16  ;;  %v746_v13 = vsel %vm357_vm0, %v3195_v60, 0  ;;  %p3350_p4 = pnand %p3349_p2, %p3343_p11 }
  0xa4   : > { %2794 = vmatprep.subr.bf16.mxu1 %v3176_v25  ;;  %2866 = vmatprep.subr.bf16.mxu0 %v3178_v27  ;;  %v1219_v31 = vshll.u32 %v2553_v23, 16  ;;  %v1207_v33 = vrot.slane %v1205_v26, 5 }
  0xa5   : > { %2798 = vmatprep.mubr.msk.bf16.mxu1 %vm344_vm1, %v3183_v30  ;;  %2870 = vmatprep.mubr.msk.bf16.mxu0 %vm344_vm1, %v2559_v11  ;;  %v1216_v30 = vshrl.u32 %v2553_v23, 16  ;;  %v556_v11 = vld [vmem:[%s3655_s29 + $0xc] sm:$0x1] }
  0xa6   : > { %v1221_v38 = vrot.slane %v1219_v31, 5  ;;  %v596_v23 = vshll.u32 %v556_v11, 16  ;;  %v3204_v11 = vld [vmem:[#allocation5 + $0x10c] sm:$0xff]  }
  0xa7   : > { %2795 = vmatpush3.bf16.msra.mxu1 %v3176_v25  ;;  %2867 = vmatpush3.bf16.msra.mxu0 %v3178_v27  ;;  %v1202_v25 = vshrl.u32 %v2551_v20, 16  ;;  %v2560_v27 = vcombine.low %v1186_v19, %v1200_v22  ;;  %v1218_v37 = vrot.slane %v1216_v30, 4  ;;  %v590_v19 = vshll.u32 %v555_v10, 16 }
  0xa8   : > { %3059 = vmatprep.subr.msk.bf16.mxu1 %vm357_vm0, %v3181_v28  ;;  %3063 = vmatprep.subr.msk.bf16.mxu0 %vm357_vm0, %v3182_v29  ;;  %v3188_v28 = vld [vmem:[#allocation5 + $0xe0] sm:$0xff]   ;;  %v1211_v29 = vshll.u32 %v2552_v21, 16  ;;  %v578_v22 = vrot.slane %v576_v15, 5  ;;  %v566_v15 = vld [vmem:[%s3655_s29 + $0x34] sm:$0x1] }
  0xa9   : > { %v1204_v32 = vrot.slane %v1202_v25, 4  ;;  %v1222_v43 = vor.u32 %v1221_v38, %v1218_v37  ;;  %v1473_v25 = vsel %vm357_vm0, %v3196_v5, 0  ;;  %v559_v38 = vld [vmem:[%s3655_s29 + $0x18] sm:$0xf] }
  0xaa   : > { %v1213_v40 = vrot.slane %v1211_v29, 5  ;;  %v615_v44 = vshrl.u32 %v559_v38, 16 }
  0xab   : > { %2797 = vmatpush3.bf16.msra.mxu1 %v486_v41  ;;  %2869 = vmatpush3.bf16.msra.mxu0 %v1319_v45  ;;  %v1208_v39 = vor.u32 %v1207_v33, %v1204_v32  ;;  %v1227_v41 = vrot.slane %v1225_v34, 5  ;;  %v2556_v45 = vld [vmem:[%s3655_s29 + $0xc4] sm:$0x1]  ;;  %v1223_v52 = vrot.slane %v1222_v43, 4  ;;  %v598_v32 = vrot.slane %v596_v23, 5 }
  0xac   : > { %2806 = vmatprep.subr.bf16.mxu1 %v3184_v53  ;;  %2878 = vmatprep.subr.bf16.mxu0 %v3185_v2  ;;  %v1239_v51 = vshll.u32 %v2556_v45, 16  ;;  %v3198_v33 = vld [vmem:[%s3655_s29 + $0x8] ss:$8 sps:$4 sm:$0xff]  }
  0xad   : > { %v1209_v47 = vrot.slane %v1208_v39, 4  ;;  %v560_v39 = vld [vmem:[%s3655_s29 + $0x1c] sm:$0x1] }
  0xae   : > { %2799 = vmatmul.mubr.msk.bf16.vlgmr.msra.gmra.mrb[0].mxu1 %vm344_vm1, %v3186_v61  ;;  %2871 = vmatmul.mubr.msk.bf16.vlgmr.msra.gmra.mrb[0].mxu0 %vm344_vm1, %v2560_v27  ;;  %v1228_v61 = vsel %vm3702_vm4, %v1223_v52, %v1227_v41  ;;  %v1241_v3 = vrot.slane %v1239_v51, 5  ;;  %v592_v27 = vrot.slane %v590_v19, 5  ;;  %v624_v48 = vshll.u32 %v560_v39, 16 }
  0xaf   : > { %2807 = vmatpush3.bf16.msra.mxu1 %v3184_v53  ;;  %2802 = vmatprep.mubr.msk.bf16.mxu1 %vm344_vm1, %v3191_v18  ;;  %v1244_v53 = vshrl.u32 %v2557_v46, 16  ;;  %v1214_v57 = vsel %vm3702_vm4, %v1209_v47, %v1213_v40  ;;  %v587_v18 = vshrl.u32 %v555_v10, 16  ;;  %v618_v47 = vshll.u32 %v559_v38, 16 }
  0xb0   : > { %2808 = vmatprep.subr.bf16.mxu1 %v3187_v14  ;;  %2879 = vmatpush3.bf16.msra.mxu0 %v3185_v2  ;;  %v2561_v1 = vcombine.low %v1214_v57, %v1228_v61  ;;  %v1236_v2 = vor.u32 %v1235_v59, %v1232_v58  ;;  %v617_v52 = vrot.slane %v615_v44, 4  ;;  %v626_v57 = vrot.slane %v624_v48, 5  ;;  %v3202_v58 = vld [vmem:[#allocation5 + $0x104] sm:$0xff]   ;;  %v3208_v48 = vld [vmem:[%s3655_s29 + $0x38] ss:$8 sps:$4 sm:$0xff]  }
  0xb1   : > { %2880 = vmatprep.subr.bf16.mxu0 %v3188_v28  ;;  %v1246_v63 = vrot.slane %v1244_v53, 4  ;;  %v589_v26 = vrot.slane %v587_v18, 4  ;;  %v3200_v53 = vld [vmem:[%s3655_s29 + $0x18] ss:$8 sps:$4 sm:$0xff]   ;;  %v620_v56 = vrot.slane %v618_v47, 5 }
  0xb2   : > { %2874 = vmatprep.mubr.msk.bf16.mxu0 %vm344_vm1, %v2561_v1  ;;  %v1237_v12 = vrot.slane %v1236_v2, 4  ;;  %v563_v1 = vld [vmem:[%s3655_s29 + $0x28] sm:$0xf]  ;;  %v564_v2 = vld [vmem:[%s3655_s29 + $0x2c] sm:$0x1] }
  0xb3   : > { %2809 = vmatpush3.bf16.msra.mxu1 %v3187_v14  ;;  %v1250_v8 = vor.u32 %v1249_v0, %v1246_v63  ;;  %v573_v14 = vshrl.u32 %v553_v6, 16  ;;  %v593_v34 = vor.u32 %v592_v27, %v589_v26  ;;  %v562_v63 = vld [vmem:[%s3655_s29 + $0x24] sm:$0x1]  ;;  %v3203_v27 = vld [vmem:[#allocation5 + $0x7c] sm:$0xff]   ;;  %v3206_v44 = vld [vmem:[%s3655_s29 + $0x28] ss:$8 sps:$4 sm:$0xff]  }
  0xb4   : > { %2810 = vmatprep.subr.bf16.mxu1 %v3189_v17  ;;  %2881 = vmatpush3.bf16.msra.mxu0 %v3188_v28  ;;  %v1242_v20 = vsel %vm3702_vm4, %v1237_v12, %v1241_v3  ;;  %v3199_v28 = vld [vmem:[#allocation5 + $0xfc] sm:$0xff]   ;;  %v638_v6 = vshll.u32 %v562_v63, 16  ;;  %v3216_v63 = vld [vmem:[#allocation5 + $0x128] sm:$0xff]  }
  0xb5   : > { %2882 = vmatprep.subr.bf16.mxu0 %v3190_v35  ;;  %v1251_v16 = vrot.slane %v1250_v8, 4  ;;  %v575_v21 = vrot.slane %v573_v14, 4  ;;  %v594_v41 = vrot.slane %v593_v34, 4  ;;  %v643_v8 = vshrl.u32 %v563_v1, 16 }
  0xb6   : > { %2803 = vmatmul.mubr.msk.bf16.gmra.mrb[4].mxu1 %vm344_vm1, %v3194_v42  ;;  %v652_v14 = vshll.u32 %v564_v2, 16  ;;  %v640_v19 = vrot.slane %v638_v6, 5  ;;  %v3217_v2 = vld [vmem:[%s3655_s29 + $0xb0] ss:$8 sps:$4 sm:$0xff]   ;;  %v3223_v6 = vld [vmem:[#allocation5 + $0x140] ss:$0 sps:$4 sm:$0xff]  }
  0xb7   : > { %2811 = vmatpush3.bf16.msra.mxu1 %v3189_v17  ;;  %v582_v17 = vshll.u32 %v554_v9, 16  ;;  %v1256_v24 = vsel %vm3702_vm4, %v1251_v16, %v1255_v4  ;;  %v579_v30 = vor.u32 %v578_v22, %v575_v21  ;;  %v599_v49 = vsel %vm3702_vm4, %v594_v41, %v598_v32  ;;  %v565_v9 = vld [vmem:[%s3655_s29 + $0x30] sm:$0xf]  ;;  %v567_v21 = vld [vmem:[%s3655_s29 + $0x38] sm:$0xf] }
  0xb8   : > { %2812 = vmatprep.subr.bf16.mxu1 %v3192_v36  ;;  %2883 = vmatpush3.bf16.msra.mxu0 %v3190_v35  ;;  %v2562_v29 = vcombine.low %v1242_v20, %v1256_v24  ;;  %v557_v35 = vld [vmem:[%s3655_s29 + $0x10] sm:$0xf]  ;;  %v645_v20 = vrot.slane %v643_v8, 4  ;;  %v654_v23 = vrot.slane %v652_v14, 5  ;;  %v568_v24 = vld [vmem:[%s3655_s29 + $0x3c] sm:$0x1] }
  0xb9   : > { %2884 = vmatprep.subr.bf16.mxu0 %v3193_v62  ;;  %v584_v31 = vrot.slane %v582_v17, 5  ;;  %v580_v37 = vrot.slane %v579_v30, 4  ;;  %v601_v40 = vshrl.u32 %v557_v35, 16  ;;  %v604_v42 = vshll.u32 %v557_v35, 16  ;;  %v3201_v17 = vld [vmem:[#allocation5 + $0x74] sm:$0xff]  }
  0xba   : > { %2875 = vmatmul.mubr.msk.bf16.gmra.mrb[4].mxu0 %vm344_vm1, %v2562_v29  ;;  %v660_v26 = vshll.u32 %v565_v9, 16  ;;  %v666_v29 = vshll.u32 %v566_v15, 16  ;;  %v671_v30 = vshrl.u32 %v567_v21, 16  ;;  %v680_v35 = vshll.u32 %v568_v24, 16  ;;  %v2614_v8 = vld [vmem:[%s3655_s29 + $0x8] sm:$0xf] }
  0xbb   : > { %2813 = vmatpush3.bf16.msra.mxu1 %v3192_v36  ;;  %v558_v36 = vld [vmem:[%s3655_s29 + $0x14] sm:$0x1]  ;;  %2888 = vmatprep.mubr.msk.bf16.mxu0 %vm344_vm1, %v3198_v33  ;;  %v585_v45 = vsel %vm3702_vm4, %v580_v37, %v584_v31  ;;  %v603_v46 = vrot.slane %v601_v40, 4  ;;  %v606_v50 = vrot.slane %v604_v42, 5  ;;  %v674_v31 = vshll.u32 %v567_v21, 16 }
  0xbc   : > { %3060 = vmatprep.subr.msk.bf16.mxu1 %vm357_vm0, %v3195_v60  ;;  %2885 = vmatpush3.bf16.msra.mxu0 %v3193_v62  ;;  %v610_v43 = vshll.u32 %v558_v36, 16  ;;  %v2488_v55 = vcombine.low %v585_v45, %v599_v49  ;;  %v621_v60 = vor.u32 %v620_v56, %v617_v52  ;;  %v561_v62 = vld [vmem:[%s3655_s29 + $0x20] sm:$0xf]  ;;  %v662_v34 = vrot.slane %v660_v26, 5  ;;  %v3207_v36 = vld [vmem:[#allocation5 + $0x114] sm:$0xff]  }
  0xbd   : > { %3064 = vmatprep.subr.msk.bf16.mxu0 %vm357_vm0, %v3196_v5  ;;  %v607_v59 = vor.u32 %v606_v50, %v603_v46  ;;  %v629_v3 = vshrl.u32 %v561_v62, 16  ;;  %v632_v5 = vshll.u32 %v561_v62, 16  ;;  %v668_v38 = vrot.slane %v666_v29, 5  ;;  %v3209_v52 = vld [vmem:[#allocation5 + $0x8c] ss:$0 sps:$4 sm:$0xff]  }
  0xbe   : > { %v612_v51 = vrot.slane %v610_v43, 5  ;;  %2816 = vmatprep.mubr.msk.bf16.mxu1 %vm344_vm1, %v2488_v55  ;;  %v622_v0 = vrot.slane %v621_v60, 4  ;;  %v673_v39 = vrot.slane %v671_v30, 4  ;;  %v676_v40 = vrot.slane %v674_v31, 5  ;;  %v3210_v55 = vld [vmem:[#allocation5 + $0x11c] ss:$0 sps:$4 sm:$0xff]  }
  0xbf   : > { %2815 = vmatpush3.bf16.msra.mxu1 %v746_v13  ;;  %v608_v61 = vrot.slane %v607_v59, 4  ;;  %v631_v12 = vrot.slane %v629_v3, 4  ;;  %v646_v13 = vshll.u32 %v563_v1, 16  ;;  %v634_v18 = vrot.slane %v632_v5, 5  ;;  %v3213_v62 = vld [vmem:[%s3655_s29 + $0x50] ss:$8 sps:$4 sm:$0xff]  }
  0xc0   : > { %2824 = vmatprep.subr.bf16.mxu1 %v3738_v7  ;;  %2887 = vmatpush3.bf16.msra.mxu0 %v1473_v25  ;;  %v627_v10 = vsel %vm3702_vm4, %v622_v0, %v626_v57  ;;  %v657_v25 = vshrl.u32 %v565_v9, 16  ;;  %v682_v43 = vrot.slane %v680_v35, 5  ;;  %v677_v45 = vor.u32 %v676_v40, %v673_v39  ;;  %v3211_v57 = vld [vmem:[%s3655_s29 + $0x90] ss:$8 sps:$4 sm:$0xff]   ;;  %v3215_v0 = vld [vmem:[%s3655_s29 + $0x60] ss:$8 sps:$4 sm:$0xff]  }
  0xc1   : > { %2896 = vmatprep.subr.bf16.mxu0 %v3199_v28  ;;  %v613_v4 = vsel %vm3702_vm4, %v608_v61, %v612_v51  ;;  %v648_v22 = vrot.slane %v646_v13, 5  ;;  %v3205_v51 = vld [vmem:[#allocation5 + $0x84] sm:$0xff]   ;;  %v1627_v59 = vsel %vm357_vm0, %v3210_v55, 0  ;;  %v900_v60 = vsel %vm357_vm0, %v3209_v52, 0  ;;  %v3219_v3 = vld [vmem:[#allocation5 + $0x130] sm:$0xff]  }
  0xc2   : > { %v2489_v16 = vcombine.low %v613_v4, %v627_v10  ;;  %v659_v33 = vrot.slane %v657_v25, 4  ;;  %v678_v50 = vrot.slane %v677_v45, 4  ;;  %v3214_v61 = vld [vmem:[#allocation5 + $0x120] sm:$0xff]   ;;  %v3220_v4 = vld [vmem:[%s3655_s29 + $0x70] ss:$8 sps:$4 sm:$0xff]   ;;  %v1719_v13 = vshrl.u32 %v2614_v8, 16 }
  0xc3   : > { %2889 = vmatmul.mubr.msk.bf16.vlgmr.msra.gmra.mrb[0].mxu0 %vm344_vm1, %v3200_v53  ;;  %v649_v32 = vor.u32 %v648_v22, %v645_v20  ;;  %v3212_v1 = vld [vmem:[%s3655_s29 + $0xa0] ss:$8 sps:$4 sm:$0xff]   ;;  %v2615_v9 = vld [vmem:[%s3655_s29 + $0xc] sm:$0x1]  ;;  %v2616_v10 = vld [vmem:[%s3655_s29 + $0x10] sm:$0xf] }
  0xc4   : > { %2897 = vmatpush3.bf16.msra.mxu0 %v3199_v28  ;;  %2817 = vmatmul.mubr.msk.bf16.vlgmr.msra.gmra.mrb[0].mxu1 %vm344_vm1, %v2489_v16  ;;  %v635_v28 = vor.u32 %v634_v18, %v631_v12  ;;  %v663_v42 = vor.u32 %v662_v34, %v659_v33  ;;  %v683_v56 = vsel %vm3702_vm4, %v678_v50, %v682_v43  ;;  %v3221_v5 = vld [vmem:[%s3655_s29 + $0x80] ss:$8 sps:$4 sm:$0xff]   ;;  %v3222_v12 = vld [vmem:[#allocation5 + $0x138] sm:$0xff]   ;;  %v1722_v14 = vshll.u32 %v2614_v8, 16  ;;  %v2621_v31 = vld [vmem:[%s3655_s29 + $0x24] sm:$0x1] }
  0xc5   : > { %2898 = vmatprep.subr.bf16.mxu0 %v3202_v58  ;;  %2825 = vmatpush3.bf16.msra.mxu1 %v3738_v7  ;;  %v650_v41 = vrot.slane %v649_v32, 4  ;;  %v1728_v15 = vshll.u32 %v2615_v9, 16  ;;  %v2618_v16 = vld [vmem:[%s3655_s29 + $0x18] sm:$0xf]  ;;  %v1733_v18 = vshrl.u32 %v2616_v10, 16  ;;  %v1721_v24 = vrot.slane %v1719_v13, 4 }
  0xc6   : > { %2826 = vmatprep.subr.bf16.mxu1 %v3201_v17  ;;  %v636_v37 = vrot.slane %v635_v28, 4  ;;  %v664_v47 = vrot.slane %v663_v42, 4  ;;  %2892 = vmatprep.mubr.msk.bf16.mxu0 %vm344_vm1, %v3206_v44  ;;  %v2619_v21 = vld [vmem:[%s3655_s29 + $0x1c] sm:$0x1]  ;;  %v1747_v22 = vshrl.u32 %v2618_v16, 16  ;;  %v1724_v25 = vrot.slane %v1722_v14, 5 }
  0xc7   : > { %v655_v46 = vsel %vm3702_vm4, %v650_v41, %v654_v23  ;;  %v1892_v23 = vsel %vm357_vm0, %v3223_v6, 0  ;;  %v2620_v26 = vld [vmem:[%s3655_s29 + $0x20] sm:$0xf]  ;;  %v1730_v28 = vrot.slane %v1728_v15, 5  ;;  %v1735_v29 = vrot.slane %v1733_v18, 4 }
  0xc8   : > { %2899 = vmatpush3.bf16.msra.mxu0 %v3202_v58  ;;  %v641_v7 = vsel %vm3702_vm4, %v636_v37, %v640_v19  ;;  %v669_v53 = vsel %vm3702_vm4, %v664_v47, %v668_v38  ;;  %v1736_v19 = vshll.u32 %v2616_v10, 16  ;;  %v1749_v32 = vrot.slane %v1747_v22, 4  ;;  %v2622_v37 = vld [vmem:[%s3655_s29 + $0x28] sm:$0xf]  ;;  %v2623_v42 = vld [vmem:[%s3655_s29 + $0x2c] sm:$0x1] }
  0xc9   : > { %2900 = vmatprep.subr.bf16.mxu0 %v3204_v11  ;;  %2827 = vmatpush3.bf16.msra.mxu1 %v3201_v17  ;;  %v2490_v49 = vcombine.low %v641_v7, %v655_v46  ;;  %v2491_v58 = vcombine.low %v669_v53, %v683_v56  ;;  %v3218_v17 = vld [vmem:[%s3655_s29 + $0xc0] ss:$8 sps:$4 sm:$0xff]   ;;  %v1725_v33 = vor.u32 %v1724_v25, %v1721_v24  ;;  %v1756_v35 = vshll.u32 %v2619_v21, 16  ;;  %v2624_v46 = vld [vmem:[%s3655_s29 + $0x30] sm:$0xf] }
  0xca   : > { %2828 = vmatprep.subr.bf16.mxu1 %v3203_v27  ;;  %v1738_v30 = vrot.slane %v1736_v19, 5  ;;  %v1764_v40 = vshll.u32 %v2620_v26, 16  ;;  %v1770_v41 = vshll.u32 %v2621_v31, 16  ;;  %v1775_v50 = vshrl.u32 %v2622_v37, 16  ;;  %v2625_v53 = vld [vmem:[%s3655_s29 + $0x34] sm:$0x1] }
  0xcb   : > { %2893 = vmatmul.mubr.msk.bf16.gmra.mrb[4].mxu0 %vm344_vm1, %v3208_v48  ;;  %2820 = vmatprep.mubr.msk.bf16.mxu1 %vm344_vm1, %v2490_v49  ;;  %v1726_v43 = vrot.slane %v1725_v33, 4  ;;  %v1758_v7 = vrot.slane %v1756_v35, 5  ;;  %v1784_v56 = vshll.u32 %v2623_v42, 16  ;;  %v1798_v8 = vshll.u32 %v2625_v53, 16  ;;  %v2629_v15 = vld [vmem:[%s3655_s29 + $0x44] sm:$0x1] }
  0xcc   : > { %2901 = vmatpush3.bf16.msra.mxu0 %v3204_v11  ;;  %2821 = vmatmul.mubr.msk.bf16.gmra.mrb[4].mxu1 %vm344_vm1, %v2491_v58  ;;  %v2617_v11 = vld [vmem:[%s3655_s29 + $0x14] sm:$0x1]  ;;  %v1739_v38 = vor.u32 %v1738_v30, %v1735_v29  ;;  %v1766_v48 = vrot.slane %v1764_v40, 5  ;;  %v1772_v49 = vrot.slane %v1770_v41, 5  ;;  %v2035_v41 = vld [vmem:[#allocation7] sm:$0xff]  ;;  %v2036_v42 = vld [vmem:[#allocation7 + $0x8] sm:$0xff] }
  0xcd   : > { %2902 = vmatprep.subr.bf16.mxu0 %v3207_v36  ;;  %2829 = vmatpush3.bf16.msra.mxu1 %v3203_v27  ;;  %v1742_v20 = vshll.u32 %v2617_v11, 16  ;;  %v1750_v27 = vshll.u32 %v2618_v16, 16  ;;  %v1786_v10 = vrot.slane %v1784_v56, 5 }
  0xce   : > { %2830 = vmatprep.subr.bf16.mxu1 %v3205_v51  ;;  %2834 = vmatprep.mubr.msk.bf16.mxu1 %vm344_vm1, %v3211_v57  ;;  %v1740_v47 = vrot.slane %v1739_v38, 4 }
  0xcf   : > { %2906 = vmatprep.mubr.msk.bf16.mxu0 %vm344_vm1, %v3213_v62  ;;  %v1752_v34 = vrot.slane %v1750_v27, 5  ;;  %v1744_v39 = vrot.slane %v1742_v20, 5  ;;  %v2627_v62 = vld [vmem:[%s3655_s29 + $0x3c] sm:$0x1]  ;;  %v1826_v27 = vshll.u32 %v2629_v15, 16 }
  0xd0   : > { %2903 = vmatpush3.bf16.msra.mxu0 %v3207_v36  ;;  %v1761_v36 = vshrl.u32 %v2620_v26, 16  ;;  %v1812_v16 = vshll.u32 %v2627_v62, 16 }
  0xd1   : > { %3065 = vmatprep.subr.msk.bf16.mxu0 %vm357_vm0, %v3210_v55  ;;  %2831 = vmatpush3.bf16.msra.mxu1 %v3205_v51  ;;  %v1753_v44 = vor.u32 %v1752_v34, %v1749_v32  ;;  %v1731_v51 = vsel %vm3702_vm4, %v1726_v43, %v1730_v28  ;;  %v1778_v55 = vshll.u32 %v2622_v37, 16  ;;  %v1745_v57 = vsel %vm3702_vm4, %v1740_v47, %v1744_v39  ;;  %v2040_v47 = vld [vmem:[#allocation7 + $0x28] sm:$0xff] }
  0xd2   : > { %3061 = vmatprep.subr.msk.bf16.mxu1 %vm357_vm0, %v3209_v52  ;;  %v1763_v45 = vrot.slane %v1761_v36, 4  ;;  %v1814_v30 = vrot.slane %v1812_v16, 5  ;;  %v1828_v35 = vrot.slane %v1826_v27, 5  ;;  %v3854_v43 = vpack.c.bf16 %v2036_v42, %v2035_v41 }
  0xd3   : > { %v1754_v52 = vrot.slane %v1753_v44, 4  ;;  %v3425_v44 = vmov 0.0|0.0  }
  0xd4   : > { %2905 = vmatpush3.bf16.msra.mxu0 %v1627_v59  ;;  %v1767_v58 = vor.u32 %v1766_v48, %v1763_v45  ;;  %v1777_v59 = vrot.slane %v1775_v50, 4  ;;  %v2038_v45 = vld [vmem:[#allocation7 + $0x18] sm:$0xff]  ;;  %v3863_v48 = vpack.c.bf16 %v2040_v47, %v2039_v54 }
  0xd5   : > { %2914 = vmatprep.subr.bf16.mxu0 %v3214_v61  ;;  %2833 = vmatpush3.bf16.msra.mxu1 %v900_v60  ;;  %v1789_v60 = vshrl.u32 %v2624_v46, 16  ;;  %v2042_v50 = vld [vmem:[#allocation7 + $0x38] sm:$0xff] }
  0xd6   : > { %2970 = vmatprep.subr.bf16.mxu1 %v3425_v44 }
  0xd7   : > { %2907 = vmatmul.mubr.msk.bf16.vlgmr.msra.gmra.mrb[0].mxu0 %vm344_vm1, %v3215_v0  ;;  %v1759_v0 = vsel %vm3702_vm4, %v1754_v52, %v1758_v7  ;;  %v2037_v7 = vld [vmem:[#allocation7 + $0x10] sm:$0xff] }
  0xd8   : > { %2915 = vmatpush3.bf16.msra.mxu0 %v3214_v61  ;;  %2910 = vmatprep.mubr.msk.bf16.mxu0 %vm344_vm1, %v3220_v4  ;;  %v2626_v61 = vld [vmem:[%s3655_s29 + $0x38] sm:$0xf]  ;;  %v1768_v4 = vrot.slane %v1767_v58, 4 }
  0xd9   : > { %2916 = vmatprep.subr.bf16.mxu0 %v3216_v63  ;;  %2835 = vmatmul.mubr.msk.bf16.vlgmr.msra.gmra.mrb[0].mxu1 %vm344_vm1, %v3212_v1  ;;  %v1780_v1 = vrot.slane %v1778_v55, 5  ;;  %v1803_v11 = vshrl.u32 %v2626_v61, 16 }
  0xda   : > { %2838 = vmatprep.mubr.msk.bf16.mxu1 %vm344_vm1, %v3217_v2  ;;  %v2628_v2 = vld [vmem:[%s3655_s29 + $0x40] sm:$0xf]  ;;  %v1773_v13 = vsel %vm3702_vm4, %v1768_v4, %v1772_v49  ;;  %2972 = vmatpush3.bf16.msra.mxu1 %v3854_v43  ;;  %v2041_v49 = vld [vmem:[#allocation7 + $0x30] sm:$0xff] }
  0xdb   : > { %v1781_v9 = vor.u32 %v1780_v1, %v1777_v59  ;;  %v2631_v18 = vcombine.low %v1759_v0, %v1773_v13  ;;  %v1805_v20 = vrot.slane %v1803_v11, 4  ;;  %v1820_v25 = vshll.u32 %v2628_v2, 16  ;;  %2973 = vmatprep.subr.bf16.mxu1 %v3425_v44 }
  0xdc   : > { %2917 = vmatpush3.bf16.msra.mxu0 %v3216_v63  ;;  %v2630_v63 = vcombine.low %v1731_v51, %v1745_v57  ;;  %v3427_v51 = vmov 0.0   ;;  %v3868_v52 = vpack.c.bf16 %v2042_v50, %v2041_v49 }
  0xdd   : > { %2918 = vmatprep.subr.bf16.mxu0 %v3219_v3  ;;  %v1782_v19 = vrot.slane %v1781_v9, 4  ;;  %v1822_v31 = vrot.slane %v1820_v25, 5 }
  0xdf   : > { %2911 = vmatmul.mubr.msk.bf16.gmra.mrb[4].mxu0 %vm344_vm1, %v3221_v5  ;;  %v1791_v5 = vrot.slane %v1789_v60, 4  ;;  %v1787_v28 = vsel %vm3702_vm4, %v1782_v19, %v1786_v10 }
  0xe0   : > { %2919 = vmatpush3.bf16.msra.mxu0 %v3219_v3  ;;  %v2643_v3 = vld [vmem:[#allocation8] ss:$0 sm:$0xff]  ;;  %2924 = vmatprep.mubr.msk.bf16.mxu0 %vm344_vm1, %v2630_v63 }
  0xe1   : > { %2920 = vmatprep.subr.bf16.mxu0 %v3222_v12  ;;  %2839 = vmatmul.mubr.msk.bf16.gmra.mrb[4].mxu1 %vm344_vm1, %v3218_v17  ;;  %v1817_v17 = vshrl.u32 %v2628_v2, 16 }
  0xe2   : > { %1973 = vrot.lane.b32.xlu0 %v2643_v3, %s3424_s21  ;;  %2948 = vmatprep.mubr.msk.f32.mxu1 %vm3426_vm5, %v3427_v51 }
  0xe3   : > { %v1819_v24 = vrot.slane %v1817_v17, 4 }
  0xe4   : > { %2921 = vmatpush3.bf16.msra.mxu0 %v3222_v12  ;;  %v1806_v12 = vshll.u32 %v2626_v61, 16 }
  0xe5   : > { %3066 = vmatprep.subr.msk.bf16.mxu0 %vm357_vm0, %v3223_v6  ;;  %v1792_v6 = vshll.u32 %v2624_v46, 16  ;;  %v1823_v34 = vor.u32 %v1822_v31, %v1819_v24  ;;  %v3859_v46 = vpack.c.bf16 %v2038_v45, %v2037_v7 }
  0xe6   : > { %v1808_v21 = vrot.slane %v1806_v12, 5 }
  0xe7   : > { %v1794_v14 = vrot.slane %v1792_v6, 5  ;;  %v1824_v38 = vrot.slane %v1823_v34, 4  ;;  %2975 = vmatpush3.bf16.msra.mxu1 %v3859_v46 }
  0xe8   : > { %2923 = vmatpush3.bf16.msra.mxu0 %v1892_v23  ;;  %v1800_v23 = vrot.slane %v1798_v8, 5  ;;  %v1809_v26 = vor.u32 %v1808_v21, %v1805_v20  ;;  %2976 = vmatprep.subr.bf16.mxu1 %v3425_v44 }
  0xe9   : > { %v1795_v22 = vor.u32 %v1794_v14, %v1791_v5  ;;  %v1829_v39 = vsel %vm3702_vm4, %v1824_v38, %v1828_v35 }
  0xea   : > { %v1810_v32 = vrot.slane %v1809_v26, 4 }
  0xeb   : > { %2925 = vmatmul.mubr.msk.bf16.vlgmr.msra.gmra.mrb[0].mxu0 %vm344_vm1, %v2631_v18  ;;  %v1796_v29 = vrot.slane %v1795_v22, 4  ;;  %2978 = vmatpush3.bf16.msra.mxu1 %v3863_v48 }
  0xec   : > { %v1815_v37 = vsel %vm3702_vm4, %v1810_v32, %v1814_v30  ;;  %2979 = vmatprep.subr.bf16.mxu1 %v3425_v44 }
  0xed   : > { %v1801_v33 = vsel %vm3702_vm4, %v1796_v29, %v1800_v23  ;;  %v2633_v40 = vcombine.low %v1815_v37, %v1829_v39 }
  0xee   : > { %v2632_v36 = vcombine.low %v1787_v28, %v1801_v33 }
  0xef   : > { %2981 = vmatpush3.bf16.msra.mxu1 %v3868_v52 }
  0xf0   : > { %2928 = vmatprep.mubr.msk.bf16.mxu0 %vm344_vm1, %v2632_v36  ;;  %2982 = vmatprep.subr.bf16.mxu1 %v3425_v44 }
  0xf3   : > { %2929 = vmatmul.mubr.msk.bf16.gmra.mrb[4].mxu0 %vm344_vm1, %v2633_v40 }
 0x154   : > { %v3873_v63 = vpop.permute.xlu0 %1973 }
 0x1ac   : > { %v2836_v53 = vpop.f32.mrb[0].mxu1 }
 0x1ad   : > { %v936_v55 = vpop.f32.mrb[1].mxu1 }
 0x1ae   : > { %v2837_v56 = vpop.f32.mrb[2].mxu1 }
 0x1af   : > { %v939_v57 = vpop.f32.mrb[3].mxu1 }
 0x1b4   : > { %v2840_v58 = vpop.f32.mrb[4].mxu1 }
 0x1b5   : > { %v952_v59 = vpop.f32.mrb[5].mxu1 }
 0x1b6   : > { %v2841_v60 = vpop.f32.mrb[6].mxu1 }
 0x1b7   : > { %v955_v61 = vpop.f32.mrb[7].mxu1 }
 0x1be   : > { %v2926_v62 = vpop.f32.mrb[0].mxu0 }
 0x1bf   : > { %v3875_v0 = vadd.f32 %v2926_v62, %v2836_v53  ;;  %v1928_v1 = vpop.f32.mrb[1].mxu0 }
 0x1c0   : > { %v3877_v2 = vadd.f32 %v1928_v1, %v936_v55  ;;  %v2927_v3 = vpop.f32.mrb[2].mxu0 }
 0x1c1   : > { %v3879_v4 = vadd.f32 %v2927_v3, %v2837_v56  ;;  %v1931_v5 = vpop.f32.mrb[3].mxu0  ;;  %v1978_v6 = vadd.f32 %v3875_v0, %v3873_v63  ;;  %v2008_v11 = vmul.f32 %v3875_v0, %v3875_v0  ;;  %v1988_v16 = vsel %vm1984_vm6, %v3875_v0, 0.0 }
 0x1c2   : > { %v2006_v8 = vmul.f32 %v3877_v2, %v3877_v2  ;;  %v3885_v9 = vadd.f32 %v1931_v5, %v939_v57  ;;  %v1976_v10 = vadd.f32 %v3877_v2, %v3873_v63  ;;  %v1985_v12 = vsel %vm1984_vm6, %v3877_v2, 0.0 }
 0x1c3   : > { %2256 = vrot.lane.b32.xlu1 %v1978_v6, %s3424_s21  ;;  %v2009_v19 = vmul.f32 %v3879_v4, %v3879_v4  ;;  %v1979_v21 = vadd.f32 %v3879_v4, %v3873_v63  ;;  %v2017_v24 = vsel %vm1984_vm6, %v2008_v11, 0.0  ;;  %v1990_v25 = vsel %vm1984_vm6, %v3879_v4, 0.0 }
 0x1c4   : > { %v1986_v13 = vsel %vm1984_vm6, %v3885_v9, 0.0  ;;  %v2007_v14 = vmul.f32 %v3885_v9, %v3885_v9  ;;  %2252 = vrot.lane.b32.xlu0 %v1976_v10, %s3424_s21  ;;  %v1977_v15 = vadd.f32 %v3885_v9, %v3873_v63  ;;  %v2014_v18 = vsel %vm1984_vm6, %v2006_v8, 0.0 }
 0x1c5   : > { %v1987_v17 = vadd.f32 %v1986_v13, %v1985_v12  ;;  %v2019_v31 = vsel %vm1984_vm6, %v2009_v19, 0.0 }
 0x1c6   : > { %v2015_v20 = vsel %vm1984_vm6, %v2007_v14, 0.0  ;;  %v2930_v26 = vpop.f32.mrb[4].mxu0 }
 0x1c7   : > { %v1989_v22 = vadd.f32 %v1988_v16, %v1987_v17  ;;  %v2016_v23 = vadd.f32 %v2015_v20, %v2014_v18  ;;  %2254 = vrot.lane.b32.xlu1 %v1977_v15, %s3424_s21  ;;  %v3914_v28 = vadd.f32 %v2930_v26, %v2840_v58  ;;  %v1944_v29 = vpop.f32.mrb[5].mxu0 }
 0x1c8   : > { %2258 = vrot.lane.b32.xlu0 %v1979_v21, %s3424_s21  ;;  %v3917_v32 = vadd.f32 %v1944_v29, %v952_v59  ;;  %v2931_v33 = vpop.f32.mrb[6].mxu0 }
 0x1c9   : > { %v2018_v27 = vadd.f32 %v2017_v24, %v2016_v23  ;;  %v1991_v30 = vadd.f32 %v1990_v25, %v1989_v22  ;;  %v3919_v35 = vadd.f32 %v2931_v33, %v2841_v60  ;;  %v1947_v36 = vpop.f32.mrb[7].mxu0  ;;  %v2012_v41 = vmul.f32 %v3914_v28, %v3914_v28 }
 0x1ca   : > { %v1992_v37 = vsel %vm1984_vm6, %v3917_v32, 0.0  ;;  %v2010_v38 = vmul.f32 %v3917_v32, %v3917_v32  ;;  %v3925_v39 = vadd.f32 %v1947_v36, %v955_v61  ;;  %v1980_v40 = vadd.f32 %v3917_v32, %v3873_v63 }
 0x1cb   : > { %v2020_v34 = vadd.f32 %v2019_v31, %v2018_v27  ;;  %v1993_v42 = vadd.f32 %v1992_v37, %v1991_v30  ;;  %v1996_v53 = vsel %vm1984_vm6, %v3914_v28, 0.0  ;;  %v1982_v56 = vadd.f32 %v3914_v28, %v3873_v63 }
 0x1cc   : > { %v2021_v7 = vsel %vm1984_vm6, %v2010_v38, 0.0  ;;  %v1994_v45 = vsel %vm1984_vm6, %v3925_v39, 0.0  ;;  %v2011_v54 = vmul.f32 %v3925_v39, %v3925_v39  ;;  %2260 = vrot.lane.b32.xlu1 %v1980_v40, %s3424_s21  ;;  %v1981_v47 = vadd.f32 %v3925_v39, %v3873_v63 }
 0x1cd   : > { %v2022_v49 = vadd.f32 %v2021_v7, %v2020_v34  ;;  %v1995_v50 = vadd.f32 %v1994_v45, %v1993_v42  ;;  %v2025_v59 = vsel %vm1984_vm6, %v2012_v41, 0.0  ;;  %v1998_v60 = vsel %vm1984_vm6, %v3919_v35, 0.0 }
 0x1ce   : > { %v2023_v55 = vsel %vm1984_vm6, %v2011_v54, 0.0  ;;  %2262 = vrot.lane.b32.xlu0 %v1981_v47, %s3424_s21  ;;  %v2013_v61 = vmul.f32 %v3919_v35, %v3919_v35  ;;  %v1983_v62 = vadd.f32 %v3919_v35, %v3873_v63  ;;  %v2194_v24 = vlaneseq }
 0x1cf   : > { %v1997_v57 = vadd.f32 %v1996_v53, %v1995_v50  ;;  %v2024_v58 = vadd.f32 %v2023_v55, %v2022_v49 }
 0x1d0   : > { %2264 = vrot.lane.b32.xlu1 %v1982_v56, %s3424_s21  ;;  %v2027_v6 = vsel %vm1984_vm6, %v2013_v61, 0.0  ;;  %v2195_v27 = vshrl.u32 %v2194_v24, 7 }
 0x1d1   : > { %v1999_v1 = vadd.f32 %v1998_v60, %v1997_v57  ;;  %v2026_v3 = vadd.f32 %v2025_v59, %v2024_v58 }
 0x1d2   : > { %2266 = vrot.lane.b32.xlu0 %v1983_v62, %s3424_s21 }
 0x1d3   : > { %v2000_v5 = vrot.slane %v1999_v1, 4  ;;  %v2028_v10 = vadd.f32 %v2027_v6, %v2026_v3 }
 0x1d5   : > { %v2001_v8 = vadd.f32 %v2000_v5, %v1999_v1  ;;  %v2029_v13 = vrot.slane %v2028_v10, 4 }
 0x1d7   : > { %v2002_v11 = vrot.slane %v2001_v8, 2  ;;  %v2030_v16 = vadd.f32 %v2029_v13, %v2028_v10 }
 0x1d9   : > { %v2003_v12 = vadd.f32 %v2002_v11, %v2001_v8  ;;  %v2031_v63 = vrot.slane %v2030_v16, 2 }
 0x1db   : > { %v2004_v14 = vrot.slane %v2003_v12, 1  ;;  %v2032_v17 = vadd.f32 %v2031_v63, %v2030_v16 }
 0x1dd   : > { %v2005_v15 = vadd.f32 %v2004_v14, %v2003_v12  ;;  %v2033_v18 = vrot.slane %v2032_v17, 1 }
 0x1df   : > { %2949 = vmatmul.mubr.msk.f32.vlgmr.msra.gmra.mrb[8].mxu1 %vm1984_vm6, %v2005_v15  ;;  %v2034_v19 = vadd.f32 %v2033_v18, %v2032_v17 }
 0x1e0   : > { %2984 = vmatpush3.bf16.msra.mxu1 %v3854_v43  ;;  %2967 = vmatprep.mubr.msk.f32.mxu1 %vm3426_vm5, %v3427_v51 }
 0x1e1   : > { %2985 = vmatprep.subr.bf16.mxu1 %v3425_v44 }
 0x1e4   : > { %2987 = vmatpush3.bf16.msra.mxu1 %v3859_v46 }
 0x1e5   : > { %2988 = vmatprep.subr.bf16.mxu1 %v3425_v44 }
 0x1e8   : > { %2990 = vmatpush3.bf16.msra.mxu1 %v3863_v48 }
 0x1e9   : > { %2991 = vmatprep.subr.bf16.mxu1 %v3425_v44  ;;  %v2196_v44 = vsub.s32 0, %v2195_v27 }
 0x1ec   : > { %2993 = vmatpush3.bf16.msra.mxu1 %v3868_v52 }
 0x1ef   : > { %2968 = vmatmul.mubr.msk.f32.vlgmr.msra.gmra.mrb[10].mxu1 %vm1984_vm6, %v2034_v19 }
 0x235   : > { %v2257_v29 = vpop.permute.xlu1 %2256 }
 0x236   : > { %v2253_v30 = vpop.permute.xlu0 %2252 }
 0x239   : > { %v2255_v31 = vpop.permute.xlu1 %2254 }
 0x23a   : > { %v2259_v36 = vpop.permute.xlu0 %2258 }
 0x240   : > { %v2263_v56 = vpop.permute.xlu0 %2262 }
 0x244   : > { %v2267_v12 = vpop.permute.xlu0 %2266 }
 0x2b2   : > { %v2112_v43 = vpop.f32.mrb[8].mxu1 }
 0x2b3   : > { %v2950_v51 = vpop.f32.mrb[9].mxu1  ;;  %v2116_v20 = vmul.f32 0.001953125, %v2112_v43 }
 0x2b5   : > { %v2191_v22 = vmul.f32 %v2116_v20, %v2116_v20  ;;  %v2197_v52 = vrot.slane %v2116_v20, %v2196_v44 }
 0x2b7   : > { %v2198_v34 = vsub.f32 %v3877_v2, %v2197_v52  ;;  %v2199_v37 = vsub.f32 %v3885_v9, %v2197_v52  ;;  %v2200_v38 = vsub.f32 %v3875_v0, %v2197_v52  ;;  %v2201_v40 = vsub.f32 %v3879_v4, %v2197_v52  ;;  %v2261_v4 = vpop.permute.xlu1 %2260 }
 0x2b8   : > { %v2202_v42 = vsub.f32 %v3917_v32, %v2197_v52  ;;  %v2203_v7 = vsub.f32 %v3925_v39, %v2197_v52  ;;  %v2204_v45 = vsub.f32 %v3914_v28, %v2197_v52  ;;  %v2205_v54 = vsub.f32 %v3919_v35, %v2197_v52 }
 0x2bb   : > { %v2265_v11 = vpop.permute.xlu1 %2264 }
 0x2c2   : > { %v2186_v21 = vpop.f32.mrb[10].mxu1 }
 0x2c3   : > { %v2190_v23 = vmul.f32 0.001953125, %v2186_v21  ;;  %v2969_v46 = vpop.f32.mrb[11].mxu1 }
 0x2c5   : > { %v2192_v25 = vsub.f32 %v2190_v23, %v2191_v22 }
 0x2c7   : > { %v2193_v26 = vmax.f32 %v2192_v25, 0.0 }
 0x2c9   : > { %v2206_v48 = vadd.f32 1e-05, %v2193_v26 }
 0x2cb   : > { %3224 = vrsqrt.f32 %v2206_v48 }
 0x2d5   : > { %v3225_v33 = vpop.eup %3224 }
 0x2d6   : > { %v2211_v41 = vrot.slane %v3225_v33, %v2196_v44 }
 0x2d8   : > { %v2212_v47 = vmul.f32 %v2211_v41, %v2198_v34  ;;  %v2213_v49 = vmul.f32 %v2211_v41, %v2199_v37  ;;  %v2214_v2 = vmul.f32 %v2211_v41, %v2200_v38  ;;  %v2215_v50 = vmul.f32 %v2211_v41, %v2201_v40 }
 0x2d9   : > { %v2216_v53 = vmul.f32 %v2211_v41, %v2202_v42  ;;  %v2217_v9 = vmul.f32 %v2211_v41, %v2203_v7  ;;  %v2218_v55 = vmul.f32 %v2211_v41, %v2204_v45  ;;  %v2219_v0 = vmul.f32 %v2211_v41, %v2205_v54 }
 0x2da   : > { %vm2220_vm8 = vcmp.ge.f32.partialorder %v2212_v47, 0.0  ;;  %vm2221_vm9 = vcmp.ge.f32.partialorder %v2213_v49, 0.0  ;;  %vm2222_vm10 = vcmp.ge.f32.partialorder %v2214_v2, 0.0  ;;  %vm2223_vm11 = vcmp.ge.f32.partialorder %v2215_v50, 0.0 }
 0x2db   : > { %vm2224_vm12 = vcmp.ge.f32.partialorder %v2216_v53, 0.0  ;;  %vm2225_vm13 = vcmp.ge.f32.partialorder %v2217_v9, 0.0  ;;  %vm2226_vm14 = vcmp.ge.f32.partialorder %v2218_v55, 0.0  ;;  %vm2227_vm15 = vcmp.ge.f32.partialorder %v2219_v0, 0.0 }
 0x2dc   : > { %v2228_v28 = vmul.f32 0.25, %v2212_v47  ;;  %v2229_v32 = vmul.f32 0.25, %v2213_v49  ;;  %v2230_v35 = vmul.f32 0.25, %v2214_v2  ;;  %v2231_v39 = vmul.f32 0.25, %v2215_v50 }
 0x2dd   : > { %v2232_v57 = vmul.f32 0.25, %v2216_v53  ;;  %v2233_v58 = vmul.f32 0.25, %v2217_v9  ;;  %v2234_v59 = vmul.f32 0.25, %v2218_v55  ;;  %v2235_v60 = vmul.f32 0.25, %v2219_v0 }
 0x2de   : > { %v2236_v61 = vsel %vm2220_vm8, %v2212_v47, %v2228_v28  ;;  %v2237_v62 = vsel %vm2221_vm9, %v2213_v49, %v2229_v32  ;;  %v2238_v1 = vsel %vm2222_vm10, %v2214_v2, %v2230_v35  ;;  %v2239_v3 = vsel %vm2223_vm11, %v2215_v50, %v2231_v39 }
 0x2df   : > { %v2240_v5 = vsel %vm2224_vm12, %v2216_v53, %v2232_v57  ;;  %v2241_v6 = vsel %vm2225_vm13, %v2217_v9, %v2233_v58  ;;  %v2242_v8 = vsel %vm2226_vm14, %v2218_v55, %v2234_v59  ;;  %v2243_v10 = vsel %vm2227_vm15, %v2219_v0, %v2235_v60 }
 0x2e0   : > { %v2276_v13 = vadd.f32 %v2253_v30, %v2236_v61  ;;  %v2277_v14 = vadd.f32 %v2255_v31, %v2237_v62  ;;  %v2278_v15 = vadd.f32 %v2257_v29, %v2238_v1  ;;  %v2279_v16 = vadd.f32 %v2259_v36, %v2239_v3 }
 0x2e1   : > { %v2280_v63 = vadd.f32 %v2261_v4, %v2240_v5  ;;  %v2281_v17 = vadd.f32 %v2263_v56, %v2241_v6  ;;  %v2282_v18 = vadd.f32 %v2265_v11, %v2242_v8  ;;  %v2283_v19 = vadd.f32 %v2267_v12, %v2243_v10 }
 0x2e2   : > { %v2661_v43 = vpack.c.bf16 %v2276_v13, %v2276_v13  ;;  %v2662_v51 = vpack.c.bf16 %v2277_v14, %v2277_v14  ;;  %v2663_v20 = vpack.c.bf16 %v2278_v15, %v2278_v15  ;;  %v2664_v21 = vpack.c.bf16 %v2279_v16, %v2279_v16 }
 0x2e3   : > { %v2665_v22 = vpack.c.bf16 %v2280_v63, %v2280_v63  ;;  %v2666_v23 = vpack.c.bf16 %v2281_v17, %v2281_v17  ;;  %v2667_v46 = vpack.c.bf16 %v2282_v18, %v2282_v18  ;;  %v2668_v24 = vpack.c.bf16 %v2283_v19, %v2283_v19 }
 0x2e4   : > { %2317 = vst.msk [vmem:[%s258_s5] sm:$0xf] %vm2316_vm7, %v2661_v43  ;;  %2318 = vst.msk [vmem:[%s258_s5 + $0x4] sm:$0xf] %vm2316_vm7, %v2662_v51 }
 0x2e5   : > { %2319 = vst.msk [vmem:[%s258_s5 + $0x8] sm:$0xf] %vm2316_vm7, %v2663_v20  ;;  %2320 = vst.msk [vmem:[%s258_s5 + $0xc] sm:$0xf] %vm2316_vm7, %v2664_v21 }
 0x2e6   : > { %2321 = vst.msk [vmem:[%s258_s5 + $0x10] sm:$0xf] %vm2316_vm7, %v2665_v22  ;;  %2322 = vst.msk [vmem:[%s258_s5 + $0x14] sm:$0xf] %vm2316_vm7, %v2666_v23 }
 0x2e7   : > { %2323 = vst.msk [vmem:[%s258_s5 + $0x18] sm:$0xf] %vm2316_vm7, %v2667_v46  ;;  %2324 = vst.msk [vmem:[%s258_s5 + $0x1c] sm:$0xf] %vm2316_vm7, %v2668_v24 }
 0x2e8   : > { %3353 = shalt.err (!%p3350_p4)
}
 0x2e9   : > { %s3354_s10 = scalar_lea.hbm %s3987_s19, 512  ;;  %s3358_s29 = scalar_lea.hbm %s4047_s4, 1024 }
 0x2ea   : > { %p3355_p9 = scmp.ne.s32.totalorder %s3987_s19, %s3354_s10  ;;  %p3359_p8 = scmp.lt.u32.totalorder %s3987_s19, %s4047_s4 }
 0x2eb   : > { %p3360_p13 = scmp.lt.u32.totalorder %s3358_s29, %s3354_s10  ;;  %p3362_p10 = scmp.lt.u32.totalorder %s3354_s10, %s3987_s19 }
 0x2ec   : > { %p3356_p0 = pnand %p3355_p9, %p3600_p5 }
 0x2ed   : > { %p3361_p6 = por %p3360_p13, %p3359_p8 }
 0x2ee   : > { %p3357_p7 = pneg %p3356_p0 }
 0x2ef   : > { %p3363_p3 = por %p3362_p10, %p3361_p6 }
 0x2f1   : > { %p3364_p11 = pnand %p3363_p3, %p3357_p7 }
 0x2f3   : > { %3367 = shalt.err (!%p3364_p11)
}
 0x2f4   : > { %s3429_s5 = smov 4  }
 0x2f5   : > { %3083 = dma.vmem_to_hbm [thread:$0]  (%p3600_p5), %s3989_s7, 512, %s3987_s19, %s2326_s24, %s3424_s21, %s3424_s21, %s3429_s5  }
 0x2f6 PF: > { %s2354_s28 = sand.u32 1, %s3402_s15   ;;  %p4069_p12 = scmp.ne.s32.totalorder %s4053_s22, 0 }
 0x2f7   : > { %p4070_p1 = scmp.ge.s32.totalorder %s3414_s18, 2  ;;  %s2355_s9 = scalar_lea.sflag [#allocation4], %s2354_s28 }
 0x2f9   : > { %p3100_p2 = pnand %p4070_p1, %p4069_p12 }
 0x2fb   : > { %3397 = dma.done.wait (!%p3100_p2), %s2355_s9, 512  }
 0x2fc   : > { %3399 = vsyncadd (!%p3100_p2), %s2355_s9, 4294966784  ;;  %p19_p4 = scmp.ge.s32.totalorder %s3568_s27, 4   ;;  %s4071_s15 = smov %s3406_s16 }
 0x2fd   : > { %s4072_s16 = smov %s3410_s17  ;;  %s4073_s17 = smov %s3596_s26 }
 0x2fe   : > { %s4074_s18 = smov %s3568_s27  ;;  %21 = sbr.rel (!%p19_p4) target bundleno = 7 (0x7), region = 106 }
 0x305   :  { %2360 = vsyncpa [#allocation3], 1 }
 0x306   :  { %2362 = vsyncpa [#allocation3 + $0x1], 1 }
 0x307   :  { %2363 = vsyncpa [#allocation6], 1 }
 0x308   :  { %2364 = vsyncpa [#allocation9], 1 }
 0x309   :  { %2365 = vsyncpa [#allocation4], 1 }
 0x30a   :  { %2367 = vsyncpa [#allocation4 + $0x1], 1 }

</bundles_post_ra>
